<compile_context>
chip_gen: v5e
topology: v5e:2x2
jax: 0.10.0
libtpu: 0.0.40
codegen_flags: <defaults>
</compile_context>

<pallas_src>
import math

import numpy as np
import jax
import jax.numpy as jnp
from jax import lax
from jax.experimental import pallas as pl
from jax.experimental.pallas import tpu as pltpu


# ----------------------------- model config -----------------------------------
DIM = 64
N_HEADS = 4
N_KV_HEADS = 2
HEAD_DIM = DIM // N_HEADS          # 16
N_LAYERS = 2
MAX_SEQLEN = 8
MULTIPLE_OF = 32
NORM_EPS = 1e-5
ROPE_THETA = 10000.0
BATCH = 2

# FeedForward hidden dim exactly as in the module:
#   hidden = int(2 * (4*dim) / 3); hidden = multiple_of * ceil(hidden / multiple_of)
_h = int(2 * (4 * DIM) / 3)
HIDDEN_DIM = MULTIPLE_OF * ((_h + MULTIPLE_OF - 1) // MULTIPLE_OF)   # 192
HIDDEN_PAD = 256                    # lane-aligned padding (extra cols/rows are zero)


# ----------------------------- Pallas kernel -----------------------------------
def make_transformer_kernel(L, H, KV, hd, eps, hidden_pad):
    half = hd // 2                   # 8
    hpg = H // KV                    # heads per kv group (repeat_kv)
    QW = H * hd                      # 64  : q columns in the fused qkv slab
    KW = KV * hd                     # 32  : k columns
    QKVW = QW + 2 * KW               # 128 : fused qkv width (one vreg of lanes)
    dn = (((1,), (1,)), ((), ()))    # contract last dims: q @ k^T

    def kernel(x_ref, wqkv_ref, wo_ref, w13_ref, w2_ref, an_ref, fn_ref,
               c_ref, sa_ref, sb_ref, mask_ref, o_ref):
        h = x_ref[...]                       # (BS, D)
        C = c_ref[...]                       # (BS, QKVW)  cos (1.0 over v cols)
        SA = sa_ref[...]                     # (BS, QKVW)  [-sin | 0] per head (0 over v)
        SB = sb_ref[...]                     # (BS, QKVW)  [0 | sin] per head (0 over v)
        mask = mask_ref[...]                 # (H*BS, BS)  batch block-diag, head-tiled
        BS = h.shape[0]

        for l in range(L):                   # layers fused & unrolled
            wqkv = wqkv_ref[l]               # (D, QKVW)
            wo = wo_ref[l]                   # (QW, D)
            w13 = w13_ref[l]                 # (D, 2*hidden_pad)
            w2 = w2_ref[l]                   # (hidden_pad, D)

            # ---- attention_norm (RMSNorm) ----
            ms = jnp.mean(h * h, axis=-1, keepdims=True)
            xn = h * lax.rsqrt(ms + eps) * an_ref[l]

            # ---- fused q|k|v projection (single MXU launch) ----
            qkv = jnp.dot(xn, wqkv, preferred_element_type=jnp.float32)   # (BS, 128)

            # ---- full-width RoPE: rotate-half via two XLU rolls + masked tables ----
            # (wraparound lanes are multiplied by zero coefficients; v cols pass through)
            qkv = (qkv * C
                   + pltpu.roll(qkv, QKVW - half, axis=1) * SA
                   + pltpu.roll(qkv, half, axis=1) * SB)

            # ---- per-head scores (one 16-wide contraction each), stacked on sublanes ----
            scores = []
            for hh in range(H):
                g = hh // hpg
                qh = qkv[:, hh * hd:(hh + 1) * hd]                 # (BS, hd)
                kg = qkv[:, QW + g * hd:QW + (g + 1) * hd]         # (BS, hd)
                scores.append(lax.dot_general(qh, kg, dn,
                                              preferred_element_type=jnp.float32))
            s = jnp.concatenate(scores, axis=0) + mask             # (H*BS, BS)

            # ---- softmax batched across all heads (one max/exp/sum/div per layer) ----
            m = jnp.max(s, axis=-1, keepdims=True)
            p = jnp.exp(s - m)
            p = p / jnp.sum(p, axis=-1, keepdims=True)             # exact (sdpa parity)

            # ---- P@V per kv group, wo accumulated per head (no lane concat) ----
            deltas = []
            for g in range(KV):
                vg = qkv[:, QW + KW + g * hd:QW + KW + (g + 1) * hd]       # (BS, hd)
                pg = p[g * hpg * BS:(g + 1) * hpg * BS, :]                 # (hpg*BS, BS)
                og = jnp.dot(pg, vg, preferred_element_type=jnp.float32)   # (hpg*BS, hd)
                for j in range(hpg):
                    hh = g * hpg + j
                    deltas.append(jnp.dot(og[j * BS:(j + 1) * BS, :],
                                          wo[hh * hd:(hh + 1) * hd, :],
                                          preferred_element_type=jnp.float32))
            h = h + sum(deltas)

            # ---- ffn_norm (RMSNorm) + SwiGLU with fused, lane-aligned w1|w3 ----
            ms2 = jnp.mean(h * h, axis=-1, keepdims=True)
            hn = h * lax.rsqrt(ms2 + eps) * fn_ref[l]
            x13 = jnp.dot(hn, w13, preferred_element_type=jnp.float32)     # (BS, 2*hp)
            x1 = x13[:, :hidden_pad]
            x3 = x13[:, hidden_pad:]
            silu = x1 * (1.0 / (1.0 + jnp.exp(-x1)))                       # exact sigmoid
            h = h + jnp.dot(silu * x3, w2, preferred_element_type=jnp.float32)

        o_ref[...] = h

    return kernel


def base_transformer_forward(x, p, cos_t, sa_t, sb_t, mask_big):
    """Full BaseTransformer forward (all layers, all batches) in one pallas_call.

    Matches the reference with mask=None, attn_impl='sdpa' (full non-causal attention
    within each batch element).
    """
    B, S, D = x.shape
    BS = B * S
    kernel = make_transformer_kernel(N_LAYERS, N_HEADS, N_KV_HEADS, HEAD_DIM,
                                     NORM_EPS, HIDDEN_PAD)
    vmem = lambda: pl.BlockSpec(memory_space=pltpu.MemorySpace.VMEM)
    out = pl.pallas_call(
        kernel,
        out_shape=jax.ShapeDtypeStruct((BS, D), jnp.float32),
        in_specs=[vmem() for _ in range(11)],
        out_specs=vmem(),
    )(x.reshape(BS, D),
      p["wqkv"], p["wo"], p["w13"], p["w2"],
      p["attn_norm"], p["ffn_norm"],
      cos_t, sa_t, sb_t, mask_big)
    return out.reshape(B, S, D)


# ----------------------------- params / rope / mask ----------------------------
def _per_head_half_split_perm(n_heads, head_dim):
    # interleaved (GPT-J) columns -> per head: [even components | odd components].
    # Applied identically to wq and wk output columns, so q.k per head is unchanged.
    cols = []
    for h in range(n_heads):
        base = h * head_dim
        cols.append(base + np.arange(0, head_dim, 2))
        cols.append(base + np.arange(1, head_dim, 2))
    return np.concatenate(cols)


def precompute_rope_tables(head_dim, seqlen, batch, n_heads, n_kv_heads, theta):
    """cos / signed-sin tables over the full fused qkv width (identity over v cols)."""
    half = head_dim // 2
    freqs = 1.0 / (theta ** (np.arange(0, head_dim, 2)[:half].astype(np.float32) / head_dim))
    t = np.arange(seqlen, dtype=np.float32)
    ang = np.outer(t, freqs).astype(np.float32)                 # (S, half)
    cos, sin = np.cos(ang), np.sin(ang)
    zeros = np.zeros_like(sin)
    c_head = np.concatenate([cos, cos], axis=1)                 # (S, hd)
    sa_head = np.concatenate([-sin, zeros], axis=1)             # coeff for roll(+W-half)
    sb_head = np.concatenate([zeros, sin], axis=1)              # coeff for roll(+half)
    v_w = n_kv_heads * head_dim
    C = np.concatenate([np.tile(c_head, (1, n_heads)), np.tile(c_head, (1, n_kv_heads)),
                        np.ones((seqlen, v_w), np.float32)], axis=1)
    SA = np.concatenate([np.tile(sa_head, (1, n_heads)), np.tile(sa_head, (1, n_kv_heads)),
                         np.zeros((seqlen, v_w), np.float32)], axis=1)
    SB = np.concatenate([np.tile(sb_head, (1, n_heads)), np.tile(sb_head, (1, n_kv_heads)),
                         np.zeros((seqlen, v_w), np.float32)], axis=1)
    C, SA, SB = (np.tile(a, (batch, 1)).astype(np.float32) for a in (C, SA, SB))
    return jnp.asarray(C), jnp.asarray(SA), jnp.asarray(SB)


def make_batch_mask(batch, seqlen, n_heads):
    # Additive mask enforcing batch separation after flattening B into the row axis,
    # pre-tiled across the head-stacked sublane axis: (n_heads*B*S, B*S).
    bid = np.repeat(np.arange(batch), seqlen)
    m = np.where(bid[:, None] == bid[None, :], 0.0, -1e30).astype(np.float32)
    return jnp.asarray(np.tile(m, (n_heads, 1)))


def init_params(key):
    q_perm = _per_head_half_split_perm(N_HEADS, HEAD_DIM)
    k_perm = _per_head_half_split_perm(N_KV_HEADS, HEAD_DIM)
    qscale = HEAD_DIM ** -0.5                 # sdpa default scaling, folded into wq
    pad_h = HIDDEN_PAD - HIDDEN_DIM
    wqkv_l, wo_l, w13_l, w2_l, an_l, fn_l = ([] for _ in range(6))
    for _ in range(N_LAYERS):
        key, *ks = jax.random.split(key, 10)
        in_std = DIM ** -0.5
        out_std = HIDDEN_DIM ** -0.5
        # torch nn.Linear convention: weight is (out_features, in_features)
        wq = jax.random.normal(ks[0], (N_HEADS * HEAD_DIM, DIM), jnp.float32) * in_std
        wk = jax.random.normal(ks[1], (N_KV_HEADS * HEAD_DIM, DIM), jnp.float32) * in_std
        wv = jax.random.normal(ks[2], (N_KV_HEADS * HEAD_DIM, DIM), jnp.float32) * in_std
        wo = jax.random.normal(ks[3], (DIM, N_HEADS * HEAD_DIM), jnp.float32) * in_std
        w1 = jax.random.normal(ks[4], (HIDDEN_DIM, DIM), jnp.float32) * in_std
        w3 = jax.random.normal(ks[5], (HIDDEN_DIM, DIM), jnp.float32) * in_std
        w2 = jax.random.normal(ks[6], (DIM, HIDDEN_DIM), jnp.float32) * out_std
        an = 1.0 + 0.01 * jax.random.normal(ks[7], (1, DIM), jnp.float32)
        fn = 1.0 + 0.01 * jax.random.normal(ks[8], (1, DIM), jnp.float32)
        # kernel computes x @ W -> transpose to (in, out); permute wq/wk cols for RoPE,
        # fold the attention scale into wq, fuse q|k|v and w1|w3, pad hidden to 256.
        wq_t = (wq.T * qscale)[:, q_perm]                 # (D, H*hd)
        wk_t = wk.T[:, k_perm]                            # (D, KV*hd)
        wqkv_l.append(jnp.concatenate([wq_t, wk_t, wv.T], axis=1))          # (D, 128)
        wo_l.append(wo.T)                                                   # (H*hd, D)
        w1_t = jnp.pad(w1.T, ((0, 0), (0, pad_h)))                          # (D, 256)
        w3_t = jnp.pad(w3.T, ((0, 0), (0, pad_h)))                          # (D, 256)
        w13_l.append(jnp.concatenate([w1_t, w3_t], axis=1))                 # (D, 512)
        w2_l.append(jnp.pad(w2.T, ((0, pad_h), (0, 0))))                    # (256, D)
        an_l.append(an)
        fn_l.append(fn)
    return dict(
        wqkv=jnp.stack(wqkv_l), wo=jnp.stack(wo_l),
        w13=jnp.stack(w13_l), w2=jnp.stack(w2_l),
        attn_norm=jnp.stack(an_l), ffn_norm=jnp.stack(fn_l),
    )


# ----------------------------- main --------------------------------------------
if __name__ == "__main__":
    key = jax.random.PRNGKey(0)
    key, pkey, xkey = jax.random.split(key, 3)

    params = init_params(pkey)
    cos_t, sa_t, sb_t = precompute_rope_tables(HEAD_DIM, MAX_SEQLEN, BATCH,
                                               N_HEADS, N_KV_HEADS, ROPE_THETA)
    mask_big = make_batch_mask(BATCH, MAX_SEQLEN, N_HEADS)

    h = jax.random.normal(xkey, (BATCH, MAX_SEQLEN, DIM), jnp.float32)

    out = base_transformer_forward(h, params, cos_t, sa_t, sb_t, mask_big)
    out = jax.block_until_ready(out)
    assert out.shape == (BATCH, MAX_SEQLEN, DIM)
    assert bool(jnp.all(jnp.isfinite(out)))
    print("KERNEL_OK")
</pallas_src>

<mosaic_0001>
module attributes {stable_mosaic.version = 11 : i64} {
  func.func @kernel(%arg0: memref<16x64xf32, #tpu.memory_space<vmem>>, %arg1: memref<2x64x128xf32, #tpu.memory_space<vmem>>, %arg2: memref<2x64x64xf32, #tpu.memory_space<vmem>>, %arg3: memref<2x64x512xf32, #tpu.memory_space<vmem>>, %arg4: memref<2x256x64xf32, #tpu.memory_space<vmem>>, %arg5: memref<2x1x64xf32, #tpu.memory_space<vmem>>, %arg6: memref<2x1x64xf32, #tpu.memory_space<vmem>>, %arg7: memref<16x128xf32, #tpu.memory_space<vmem>>, %arg8: memref<16x128xf32, #tpu.memory_space<vmem>>, %arg9: memref<16x128xf32, #tpu.memory_space<vmem>>, %arg10: memref<64x16xf32, #tpu.memory_space<vmem>>, %arg11: memref<16x64xf32, #tpu.memory_space<vmem>>) attributes {dimension_semantics = [], scalar_prefetch = 0 : i64, scratch_operands = 0 : i64, tpu.core_type = #tpu.core_type<tc>} {
    %c0 = arith.constant 0 : index
    %c0_0 = arith.constant 0 : index
    %0 = vector.load %arg0[%c0, %c0_0] : memref<16x64xf32, #tpu.memory_space<vmem>>, vector<16x64xf32>
    %c0_1 = arith.constant 0 : index
    %c0_2 = arith.constant 0 : index
    %1 = vector.load %arg7[%c0_1, %c0_2] : memref<16x128xf32, #tpu.memory_space<vmem>>, vector<16x128xf32>
    %c0_3 = arith.constant 0 : index
    %c0_4 = arith.constant 0 : index
    %2 = vector.load %arg8[%c0_3, %c0_4] : memref<16x128xf32, #tpu.memory_space<vmem>>, vector<16x128xf32>
    %c0_5 = arith.constant 0 : index
    %c0_6 = arith.constant 0 : index
    %3 = vector.load %arg9[%c0_5, %c0_6] : memref<16x128xf32, #tpu.memory_space<vmem>>, vector<16x128xf32>
    %c0_7 = arith.constant 0 : index
    %c0_8 = arith.constant 0 : index
    %4 = vector.load %arg10[%c0_7, %c0_8] : memref<64x16xf32, #tpu.memory_space<vmem>>, vector<64x16xf32>
    %c0_9 = arith.constant 0 : index
    %c0_10 = arith.constant 0 : index
    %c0_11 = arith.constant 0 : index
    %5 = vector.load %arg1[%c0_9, %c0_10, %c0_11] : memref<2x64x128xf32, #tpu.memory_space<vmem>>, vector<1x64x128xf32>
    %6 = vector.shape_cast %5 : vector<1x64x128xf32> to vector<64x128xf32>
    %c0_12 = arith.constant 0 : index
    %c0_13 = arith.constant 0 : index
    %c0_14 = arith.constant 0 : index
    %7 = vector.load %arg2[%c0_12, %c0_13, %c0_14] : memref<2x64x64xf32, #tpu.memory_space<vmem>>, vector<1x64x64xf32>
    %8 = vector.shape_cast %7 : vector<1x64x64xf32> to vector<64x64xf32>
    %c0_15 = arith.constant 0 : index
    %c0_16 = arith.constant 0 : index
    %c0_17 = arith.constant 0 : index
    %9 = vector.load %arg3[%c0_15, %c0_16, %c0_17] : memref<2x64x512xf32, #tpu.memory_space<vmem>>, vector<1x64x512xf32>
    %10 = vector.shape_cast %9 : vector<1x64x512xf32> to vector<64x512xf32>
    %c0_18 = arith.constant 0 : index
    %c0_19 = arith.constant 0 : index
    %c0_20 = arith.constant 0 : index
    %11 = vector.load %arg4[%c0_18, %c0_19, %c0_20] : memref<2x256x64xf32, #tpu.memory_space<vmem>>, vector<1x256x64xf32>
    %12 = vector.shape_cast %11 : vector<1x256x64xf32> to vector<256x64xf32>
    %13 = arith.mulf %0, %0 : vector<16x64xf32>
    %cst = arith.constant dense<0.000000e+00> : vector<16xf32>
    %14 = vector.multi_reduction <add>, %13, %cst [1] : vector<16x64xf32> to vector<16xf32>
    %15 = vector.shape_cast %14 : vector<16xf32> to vector<16x1xf32>
    %cst_21 = arith.constant 6.400000e+01 : f32
    %16 = vector.broadcast %cst_21 : f32 to vector<16x1xf32>
    %17 = arith.divf %15, %16 : vector<16x1xf32>
    %cst_22 = arith.constant 9.99999974E-6 : f32
    %18 = vector.broadcast %cst_22 : f32 to vector<16x1xf32>
    %19 = arith.addf %17, %18 : vector<16x1xf32>
    %20 = math.rsqrt %19 : vector<16x1xf32>
    %21 = vector.broadcast %20 : vector<16x1xf32> to vector<16x64xf32>
    %22 = arith.mulf %0, %21 : vector<16x64xf32>
    %c0_23 = arith.constant 0 : index
    %c0_24 = arith.constant 0 : index
    %c0_25 = arith.constant 0 : index
    %23 = vector.load %arg5[%c0_23, %c0_24, %c0_25] : memref<2x1x64xf32, #tpu.memory_space<vmem>>, vector<1x1x64xf32>
    %24 = vector.shape_cast %23 : vector<1x1x64xf32> to vector<1x64xf32>
    %25 = vector.broadcast %24 : vector<1x64xf32> to vector<16x64xf32>
    %26 = arith.mulf %22, %25 : vector<16x64xf32>
    %cst_26 = arith.constant dense<0.000000e+00> : vector<16x128xf32>
    %27 = tpu.matmul %26, %6, %cst_26 {dimension_numbers = #tpu.dot_dimension_numbers<[1], [0], [0], [1], [0, 0, 1, 1], [], []>} : vector<16x64xf32>, vector<64x128xf32>, vector<16x128xf32> -> vector<16x128xf32>
    %28 = arith.mulf %27, %1 : vector<16x128xf32>
    %c120_i32 = arith.constant 120 : i32
    %29 = tpu.dynamic_rotate %27 by %c120_i32 dim 1 : vector<16x128xf32>, i32 -> vector<16x128xf32>
    %30 = arith.mulf %29, %2 : vector<16x128xf32>
    %31 = arith.addf %28, %30 : vector<16x128xf32>
    %c8_i32 = arith.constant 8 : i32
    %32 = tpu.dynamic_rotate %27 by %c8_i32 dim 1 : vector<16x128xf32>, i32 -> vector<16x128xf32>
    %33 = arith.mulf %32, %3 : vector<16x128xf32>
    %34 = arith.addf %31, %33 : vector<16x128xf32>
    %35 = vector.extract_strided_slice %34 {offsets = [0, 0], sizes = [16, 16], strides = [1, 1]} : vector<16x128xf32> to vector<16x16xf32>
    %36 = vector.extract_strided_slice %34 {offsets = [0, 64], sizes = [16, 16], strides = [1, 1]} : vector<16x128xf32> to vector<16x16xf32>
    %cst_27 = arith.constant dense<0.000000e+00> : vector<16x16xf32>
    %37 = tpu.matmul %35, %36, %cst_27 {dimension_numbers = #tpu.dot_dimension_numbers<[1], [1], [0], [0], [0, 0, 1, 0], [], []>} : vector<16x16xf32>, vector<16x16xf32>, vector<16x16xf32> -> vector<16x16xf32>
    %38 = vector.extract_strided_slice %34 {offsets = [0, 16], sizes = [16, 16], strides = [1, 1]} : vector<16x128xf32> to vector<16x16xf32>
    %39 = vector.extract_strided_slice %34 {offsets = [0, 64], sizes = [16, 16], strides = [1, 1]} : vector<16x128xf32> to vector<16x16xf32>
    %cst_28 = arith.constant dense<0.000000e+00> : vector<16x16xf32>
    %40 = tpu.matmul %38, %39, %cst_28 {dimension_numbers = #tpu.dot_dimension_numbers<[1], [1], [0], [0], [0, 0, 1, 0], [], []>} : vector<16x16xf32>, vector<16x16xf32>, vector<16x16xf32> -> vector<16x16xf32>
    %41 = vector.extract_strided_slice %34 {offsets = [0, 32], sizes = [16, 16], strides = [1, 1]} : vector<16x128xf32> to vector<16x16xf32>
    %42 = vector.extract_strided_slice %34 {offsets = [0, 80], sizes = [16, 16], strides = [1, 1]} : vector<16x128xf32> to vector<16x16xf32>
    %cst_29 = arith.constant dense<0.000000e+00> : vector<16x16xf32>
    %43 = tpu.matmul %41, %42, %cst_29 {dimension_numbers = #tpu.dot_dimension_numbers<[1], [1], [0], [0], [0, 0, 1, 0], [], []>} : vector<16x16xf32>, vector<16x16xf32>, vector<16x16xf32> -> vector<16x16xf32>
    %44 = vector.extract_strided_slice %34 {offsets = [0, 48], sizes = [16, 16], strides = [1, 1]} : vector<16x128xf32> to vector<16x16xf32>
    %45 = vector.extract_strided_slice %34 {offsets = [0, 80], sizes = [16, 16], strides = [1, 1]} : vector<16x128xf32> to vector<16x16xf32>
    %cst_30 = arith.constant dense<0.000000e+00> : vector<16x16xf32>
    %46 = tpu.matmul %44, %45, %cst_30 {dimension_numbers = #tpu.dot_dimension_numbers<[1], [1], [0], [0], [0, 0, 1, 0], [], []>} : vector<16x16xf32>, vector<16x16xf32>, vector<16x16xf32> -> vector<16x16xf32>
    %47 = tpu.concatenate %37, %40, %43, %46 in 0 : vector<16x16xf32>, vector<16x16xf32>, vector<16x16xf32>, vector<16x16xf32> -> vector<64x16xf32>
    %48 = arith.addf %47, %4 : vector<64x16xf32>
    %cst_31 = arith.constant dense<0xFF800000> : vector<64xf32>
    %49 = vector.multi_reduction <maximumf>, %48, %cst_31 [1] : vector<64x16xf32> to vector<64xf32>
    %50 = vector.shape_cast %49 : vector<64xf32> to vector<64x1xf32>
    %51 = vector.broadcast %50 : vector<64x1xf32> to vector<64x16xf32>
    %52 = arith.subf %48, %51 : vector<64x16xf32>
    %53 = math.exp %52 : vector<64x16xf32>
    %cst_32 = arith.constant dense<0.000000e+00> : vector<64xf32>
    %54 = vector.multi_reduction <add>, %53, %cst_32 [1] : vector<64x16xf32> to vector<64xf32>
    %55 = vector.shape_cast %54 : vector<64xf32> to vector<64x1xf32>
    %56 = vector.broadcast %55 : vector<64x1xf32> to vector<64x16xf32>
    %57 = arith.divf %53, %56 : vector<64x16xf32>
    %58 = vector.extract_strided_slice %34 {offsets = [0, 96], sizes = [16, 16], strides = [1, 1]} : vector<16x128xf32> to vector<16x16xf32>
    %59 = vector.extract_strided_slice %57 {offsets = [0, 0], sizes = [32, 16], strides = [1, 1]} : vector<64x16xf32> to vector<32x16xf32>
    %cst_33 = arith.constant dense<0.000000e+00> : vector<32x16xf32>
    %60 = tpu.matmul %59, %58, %cst_33 {dimension_numbers = #tpu.dot_dimension_numbers<[1], [0], [0], [1], [0, 0, 1, 1], [], []>} : vector<32x16xf32>, vector<16x16xf32>, vector<32x16xf32> -> vector<32x16xf32>
    %61 = vector.extract_strided_slice %60 {offsets = [0, 0], sizes = [16, 16], strides = [1, 1]} : vector<32x16xf32> to vector<16x16xf32>
    %62 = vector.extract_strided_slice %8 {offsets = [0, 0], sizes = [16, 64], strides = [1, 1]} : vector<64x64xf32> to vector<16x64xf32>
    %cst_34 = arith.constant dense<0.000000e+00> : vector<16x64xf32>
    %63 = tpu.matmul %61, %62, %cst_34 {dimension_numbers = #tpu.dot_dimension_numbers<[1], [0], [0], [1], [0, 0, 1, 1], [], []>} : vector<16x16xf32>, vector<16x64xf32>, vector<16x64xf32> -> vector<16x64xf32>
    %64 = vector.extract_strided_slice %60 {offsets = [16, 0], sizes = [16, 16], strides = [1, 1]} : vector<32x16xf32> to vector<16x16xf32>
    %65 = vector.extract_strided_slice %8 {offsets = [16, 0], sizes = [16, 64], strides = [1, 1]} : vector<64x64xf32> to vector<16x64xf32>
    %cst_35 = arith.constant dense<0.000000e+00> : vector<16x64xf32>
    %66 = tpu.matmul %64, %65, %cst_35 {dimension_numbers = #tpu.dot_dimension_numbers<[1], [0], [0], [1], [0, 0, 1, 1], [], []>} : vector<16x16xf32>, vector<16x64xf32>, vector<16x64xf32> -> vector<16x64xf32>
    %67 = vector.extract_strided_slice %34 {offsets = [0, 112], sizes = [16, 16], strides = [1, 1]} : vector<16x128xf32> to vector<16x16xf32>
    %68 = vector.extract_strided_slice %57 {offsets = [32, 0], sizes = [32, 16], strides = [1, 1]} : vector<64x16xf32> to vector<32x16xf32>
    %cst_36 = arith.constant dense<0.000000e+00> : vector<32x16xf32>
    %69 = tpu.matmul %68, %67, %cst_36 {dimension_numbers = #tpu.dot_dimension_numbers<[1], [0], [0], [1], [0, 0, 1, 1], [], []>} : vector<32x16xf32>, vector<16x16xf32>, vector<32x16xf32> -> vector<32x16xf32>
    %70 = vector.extract_strided_slice %69 {offsets = [0, 0], sizes = [16, 16], strides = [1, 1]} : vector<32x16xf32> to vector<16x16xf32>
    %71 = vector.extract_strided_slice %8 {offsets = [32, 0], sizes = [16, 64], strides = [1, 1]} : vector<64x64xf32> to vector<16x64xf32>
    %cst_37 = arith.constant dense<0.000000e+00> : vector<16x64xf32>
    %72 = tpu.matmul %70, %71, %cst_37 {dimension_numbers = #tpu.dot_dimension_numbers<[1], [0], [0], [1], [0, 0, 1, 1], [], []>} : vector<16x16xf32>, vector<16x64xf32>, vector<16x64xf32> -> vector<16x64xf32>
    %73 = vector.extract_strided_slice %69 {offsets = [16, 0], sizes = [16, 16], strides = [1, 1]} : vector<32x16xf32> to vector<16x16xf32>
    %74 = vector.extract_strided_slice %8 {offsets = [48, 0], sizes = [16, 64], strides = [1, 1]} : vector<64x64xf32> to vector<16x64xf32>
    %cst_38 = arith.constant dense<0.000000e+00> : vector<16x64xf32>
    %75 = tpu.matmul %73, %74, %cst_38 {dimension_numbers = #tpu.dot_dimension_numbers<[1], [0], [0], [1], [0, 0, 1, 1], [], []>} : vector<16x16xf32>, vector<16x64xf32>, vector<16x64xf32> -> vector<16x64xf32>
    %cst_39 = arith.constant 0.000000e+00 : f32
    %76 = vector.broadcast %cst_39 : f32 to vector<16x64xf32>
    %77 = arith.addf %76, %63 : vector<16x64xf32>
    %78 = arith.addf %77, %66 : vector<16x64xf32>
    %79 = arith.addf %78, %72 : vector<16x64xf32>
    %80 = arith.addf %79, %75 : vector<16x64xf32>
    %81 = arith.addf %0, %80 : vector<16x64xf32>
    %82 = arith.mulf %81, %81 : vector<16x64xf32>
    %cst_40 = arith.constant dense<0.000000e+00> : vector<16xf32>
    %83 = vector.multi_reduction <add>, %82, %cst_40 [1] : vector<16x64xf32> to vector<16xf32>
    %84 = vector.shape_cast %83 : vector<16xf32> to vector<16x1xf32>
    %cst_41 = arith.constant 6.400000e+01 : f32
    %85 = vector.broadcast %cst_41 : f32 to vector<16x1xf32>
    %86 = arith.divf %84, %85 : vector<16x1xf32>
    %cst_42 = arith.constant 9.99999974E-6 : f32
    %87 = vector.broadcast %cst_42 : f32 to vector<16x1xf32>
    %88 = arith.addf %86, %87 : vector<16x1xf32>
    %89 = math.rsqrt %88 : vector<16x1xf32>
    %90 = vector.broadcast %89 : vector<16x1xf32> to vector<16x64xf32>
    %91 = arith.mulf %81, %90 : vector<16x64xf32>
    %c0_43 = arith.constant 0 : index
    %c0_44 = arith.constant 0 : index
    %c0_45 = arith.constant 0 : index
    %92 = vector.load %arg6[%c0_43, %c0_44, %c0_45] : memref<2x1x64xf32, #tpu.memory_space<vmem>>, vector<1x1x64xf32>
    %93 = vector.shape_cast %92 : vector<1x1x64xf32> to vector<1x64xf32>
    %94 = vector.broadcast %93 : vector<1x64xf32> to vector<16x64xf32>
    %95 = arith.mulf %91, %94 : vector<16x64xf32>
    %cst_46 = arith.constant dense<0.000000e+00> : vector<16x512xf32>
    %96 = tpu.matmul %95, %10, %cst_46 {dimension_numbers = #tpu.dot_dimension_numbers<[1], [0], [0], [1], [0, 0, 1, 1], [], []>} : vector<16x64xf32>, vector<64x512xf32>, vector<16x512xf32> -> vector<16x512xf32>
    %97 = vector.extract_strided_slice %96 {offsets = [0, 0], sizes = [16, 256], strides = [1, 1]} : vector<16x512xf32> to vector<16x256xf32>
    %98 = vector.extract_strided_slice %96 {offsets = [0, 256], sizes = [16, 256], strides = [1, 1]} : vector<16x512xf32> to vector<16x256xf32>
    %cst_47 = arith.constant 0.000000e+00 : f32
    %99 = vector.broadcast %cst_47 : f32 to vector<16x256xf32>
    %100 = arith.subf %99, %97 : vector<16x256xf32>
    %101 = math.exp %100 : vector<16x256xf32>
    %cst_48 = arith.constant 1.000000e+00 : f32
    %102 = vector.broadcast %cst_48 : f32 to vector<16x256xf32>
    %103 = arith.addf %102, %101 : vector<16x256xf32>
    %cst_49 = arith.constant 1.000000e+00 : f32
    %104 = vector.broadcast %cst_49 : f32 to vector<16x256xf32>
    %105 = arith.divf %104, %103 : vector<16x256xf32>
    %106 = arith.mulf %97, %105 : vector<16x256xf32>
    %107 = arith.mulf %106, %98 : vector<16x256xf32>
    %cst_50 = arith.constant dense<0.000000e+00> : vector<16x64xf32>
    %108 = tpu.matmul %107, %12, %cst_50 {dimension_numbers = #tpu.dot_dimension_numbers<[1], [0], [0], [1], [0, 0, 1, 1], [], []>} : vector<16x256xf32>, vector<256x64xf32>, vector<16x64xf32> -> vector<16x64xf32>
    %109 = arith.addf %81, %108 : vector<16x64xf32>
    %c1 = arith.constant 1 : index
    %c0_51 = arith.constant 0 : index
    %c0_52 = arith.constant 0 : index
    %110 = vector.load %arg1[%c1, %c0_51, %c0_52] : memref<2x64x128xf32, #tpu.memory_space<vmem>>, vector<1x64x128xf32>
    %111 = vector.shape_cast %110 : vector<1x64x128xf32> to vector<64x128xf32>
    %c1_53 = arith.constant 1 : index
    %c0_54 = arith.constant 0 : index
    %c0_55 = arith.constant 0 : index
    %112 = vector.load %arg2[%c1_53, %c0_54, %c0_55] : memref<2x64x64xf32, #tpu.memory_space<vmem>>, vector<1x64x64xf32>
    %113 = vector.shape_cast %112 : vector<1x64x64xf32> to vector<64x64xf32>
    %c1_56 = arith.constant 1 : index
    %c0_57 = arith.constant 0 : index
    %c0_58 = arith.constant 0 : index
    %114 = vector.load %arg3[%c1_56, %c0_57, %c0_58] : memref<2x64x512xf32, #tpu.memory_space<vmem>>, vector<1x64x512xf32>
    %115 = vector.shape_cast %114 : vector<1x64x512xf32> to vector<64x512xf32>
    %c1_59 = arith.constant 1 : index
    %c0_60 = arith.constant 0 : index
    %c0_61 = arith.constant 0 : index
    %116 = vector.load %arg4[%c1_59, %c0_60, %c0_61] : memref<2x256x64xf32, #tpu.memory_space<vmem>>, vector<1x256x64xf32>
    %117 = vector.shape_cast %116 : vector<1x256x64xf32> to vector<256x64xf32>
    %118 = arith.mulf %109, %109 : vector<16x64xf32>
    %cst_62 = arith.constant dense<0.000000e+00> : vector<16xf32>
    %119 = vector.multi_reduction <add>, %118, %cst_62 [1] : vector<16x64xf32> to vector<16xf32>
    %120 = vector.shape_cast %119 : vector<16xf32> to vector<16x1xf32>
    %cst_63 = arith.constant 6.400000e+01 : f32
    %121 = vector.broadcast %cst_63 : f32 to vector<16x1xf32>
    %122 = arith.divf %120, %121 : vector<16x1xf32>
    %cst_64 = arith.constant 9.99999974E-6 : f32
    %123 = vector.broadcast %cst_64 : f32 to vector<16x1xf32>
    %124 = arith.addf %122, %123 : vector<16x1xf32>
    %125 = math.rsqrt %124 : vector<16x1xf32>
    %126 = vector.broadcast %125 : vector<16x1xf32> to vector<16x64xf32>
    %127 = arith.mulf %109, %126 : vector<16x64xf32>
    %c1_65 = arith.constant 1 : index
    %c0_66 = arith.constant 0 : index
    %c0_67 = arith.constant 0 : index
    %128 = vector.load %arg5[%c1_65, %c0_66, %c0_67] : memref<2x1x64xf32, #tpu.memory_space<vmem>>, vector<1x1x64xf32>
    %129 = vector.shape_cast %128 : vector<1x1x64xf32> to vector<1x64xf32>
    %130 = vector.broadcast %129 : vector<1x64xf32> to vector<16x64xf32>
    %131 = arith.mulf %127, %130 : vector<16x64xf32>
    %cst_68 = arith.constant dense<0.000000e+00> : vector<16x128xf32>
    %132 = tpu.matmul %131, %111, %cst_68 {dimension_numbers = #tpu.dot_dimension_numbers<[1], [0], [0], [1], [0, 0, 1, 1], [], []>} : vector<16x64xf32>, vector<64x128xf32>, vector<16x128xf32> -> vector<16x128xf32>
    %133 = arith.mulf %132, %1 : vector<16x128xf32>
    %c120_i32_69 = arith.constant 120 : i32
    %134 = tpu.dynamic_rotate %132 by %c120_i32_69 dim 1 : vector<16x128xf32>, i32 -> vector<16x128xf32>
    %135 = arith.mulf %134, %2 : vector<16x128xf32>
    %136 = arith.addf %133, %135 : vector<16x128xf32>
    %c8_i32_70 = arith.constant 8 : i32
    %137 = tpu.dynamic_rotate %132 by %c8_i32_70 dim 1 : vector<16x128xf32>, i32 -> vector<16x128xf32>
    %138 = arith.mulf %137, %3 : vector<16x128xf32>
    %139 = arith.addf %136, %138 : vector<16x128xf32>
    %140 = vector.extract_strided_slice %139 {offsets = [0, 0], sizes = [16, 16], strides = [1, 1]} : vector<16x128xf32> to vector<16x16xf32>
    %141 = vector.extract_strided_slice %139 {offsets = [0, 64], sizes = [16, 16], strides = [1, 1]} : vector<16x128xf32> to vector<16x16xf32>
    %cst_71 = arith.constant dense<0.000000e+00> : vector<16x16xf32>
    %142 = tpu.matmul %140, %141, %cst_71 {dimension_numbers = #tpu.dot_dimension_numbers<[1], [1], [0], [0], [0, 0, 1, 0], [], []>} : vector<16x16xf32>, vector<16x16xf32>, vector<16x16xf32> -> vector<16x16xf32>
    %143 = vector.extract_strided_slice %139 {offsets = [0, 16], sizes = [16, 16], strides = [1, 1]} : vector<16x128xf32> to vector<16x16xf32>
    %144 = vector.extract_strided_slice %139 {offsets = [0, 64], sizes = [16, 16], strides = [1, 1]} : vector<16x128xf32> to vector<16x16xf32>
    %cst_72 = arith.constant dense<0.000000e+00> : vector<16x16xf32>
    %145 = tpu.matmul %143, %144, %cst_72 {dimension_numbers = #tpu.dot_dimension_numbers<[1], [1], [0], [0], [0, 0, 1, 0], [], []>} : vector<16x16xf32>, vector<16x16xf32>, vector<16x16xf32> -> vector<16x16xf32>
    %146 = vector.extract_strided_slice %139 {offsets = [0, 32], sizes = [16, 16], strides = [1, 1]} : vector<16x128xf32> to vector<16x16xf32>
    %147 = vector.extract_strided_slice %139 {offsets = [0, 80], sizes = [16, 16], strides = [1, 1]} : vector<16x128xf32> to vector<16x16xf32>
    %cst_73 = arith.constant dense<0.000000e+00> : vector<16x16xf32>
    %148 = tpu.matmul %146, %147, %cst_73 {dimension_numbers = #tpu.dot_dimension_numbers<[1], [1], [0], [0], [0, 0, 1, 0], [], []>} : vector<16x16xf32>, vector<16x16xf32>, vector<16x16xf32> -> vector<16x16xf32>
    %149 = vector.extract_strided_slice %139 {offsets = [0, 48], sizes = [16, 16], strides = [1, 1]} : vector<16x128xf32> to vector<16x16xf32>
    %150 = vector.extract_strided_slice %139 {offsets = [0, 80], sizes = [16, 16], strides = [1, 1]} : vector<16x128xf32> to vector<16x16xf32>
    %cst_74 = arith.constant dense<0.000000e+00> : vector<16x16xf32>
    %151 = tpu.matmul %149, %150, %cst_74 {dimension_numbers = #tpu.dot_dimension_numbers<[1], [1], [0], [0], [0, 0, 1, 0], [], []>} : vector<16x16xf32>, vector<16x16xf32>, vector<16x16xf32> -> vector<16x16xf32>
    %152 = tpu.concatenate %142, %145, %148, %151 in 0 : vector<16x16xf32>, vector<16x16xf32>, vector<16x16xf32>, vector<16x16xf32> -> vector<64x16xf32>
    %153 = arith.addf %152, %4 : vector<64x16xf32>
    %cst_75 = arith.constant dense<0xFF800000> : vector<64xf32>
    %154 = vector.multi_reduction <maximumf>, %153, %cst_75 [1] : vector<64x16xf32> to vector<64xf32>
    %155 = vector.shape_cast %154 : vector<64xf32> to vector<64x1xf32>
    %156 = vector.broadcast %155 : vector<64x1xf32> to vector<64x16xf32>
    %157 = arith.subf %153, %156 : vector<64x16xf32>
    %158 = math.exp %157 : vector<64x16xf32>
    %cst_76 = arith.constant dense<0.000000e+00> : vector<64xf32>
    %159 = vector.multi_reduction <add>, %158, %cst_76 [1] : vector<64x16xf32> to vector<64xf32>
    %160 = vector.shape_cast %159 : vector<64xf32> to vector<64x1xf32>
    %161 = vector.broadcast %160 : vector<64x1xf32> to vector<64x16xf32>
    %162 = arith.divf %158, %161 : vector<64x16xf32>
    %163 = vector.extract_strided_slice %139 {offsets = [0, 96], sizes = [16, 16], strides = [1, 1]} : vector<16x128xf32> to vector<16x16xf32>
    %164 = vector.extract_strided_slice %162 {offsets = [0, 0], sizes = [32, 16], strides = [1, 1]} : vector<64x16xf32> to vector<32x16xf32>
    %cst_77 = arith.constant dense<0.000000e+00> : vector<32x16xf32>
    %165 = tpu.matmul %164, %163, %cst_77 {dimension_numbers = #tpu.dot_dimension_numbers<[1], [0], [0], [1], [0, 0, 1, 1], [], []>} : vector<32x16xf32>, vector<16x16xf32>, vector<32x16xf32> -> vector<32x16xf32>
    %166 = vector.extract_strided_slice %165 {offsets = [0, 0], sizes = [16, 16], strides = [1, 1]} : vector<32x16xf32> to vector<16x16xf32>
    %167 = vector.extract_strided_slice %113 {offsets = [0, 0], sizes = [16, 64], strides = [1, 1]} : vector<64x64xf32> to vector<16x64xf32>
    %cst_78 = arith.constant dense<0.000000e+00> : vector<16x64xf32>
    %168 = tpu.matmul %166, %167, %cst_78 {dimension_numbers = #tpu.dot_dimension_numbers<[1], [0], [0], [1], [0, 0, 1, 1], [], []>} : vector<16x16xf32>, vector<16x64xf32>, vector<16x64xf32> -> vector<16x64xf32>
    %169 = vector.extract_strided_slice %165 {offsets = [16, 0], sizes = [16, 16], strides = [1, 1]} : vector<32x16xf32> to vector<16x16xf32>
    %170 = vector.extract_strided_slice %113 {offsets = [16, 0], sizes = [16, 64], strides = [1, 1]} : vector<64x64xf32> to vector<16x64xf32>
    %cst_79 = arith.constant dense<0.000000e+00> : vector<16x64xf32>
    %171 = tpu.matmul %169, %170, %cst_79 {dimension_numbers = #tpu.dot_dimension_numbers<[1], [0], [0], [1], [0, 0, 1, 1], [], []>} : vector<16x16xf32>, vector<16x64xf32>, vector<16x64xf32> -> vector<16x64xf32>
    %172 = vector.extract_strided_slice %139 {offsets = [0, 112], sizes = [16, 16], strides = [1, 1]} : vector<16x128xf32> to vector<16x16xf32>
    %173 = vector.extract_strided_slice %162 {offsets = [32, 0], sizes = [32, 16], strides = [1, 1]} : vector<64x16xf32> to vector<32x16xf32>
    %cst_80 = arith.constant dense<0.000000e+00> : vector<32x16xf32>
    %174 = tpu.matmul %173, %172, %cst_80 {dimension_numbers = #tpu.dot_dimension_numbers<[1], [0], [0], [1], [0, 0, 1, 1], [], []>} : vector<32x16xf32>, vector<16x16xf32>, vector<32x16xf32> -> vector<32x16xf32>
    %175 = vector.extract_strided_slice %174 {offsets = [0, 0], sizes = [16, 16], strides = [1, 1]} : vector<32x16xf32> to vector<16x16xf32>
    %176 = vector.extract_strided_slice %113 {offsets = [32, 0], sizes = [16, 64], strides = [1, 1]} : vector<64x64xf32> to vector<16x64xf32>
    %cst_81 = arith.constant dense<0.000000e+00> : vector<16x64xf32>
    %177 = tpu.matmul %175, %176, %cst_81 {dimension_numbers = #tpu.dot_dimension_numbers<[1], [0], [0], [1], [0, 0, 1, 1], [], []>} : vector<16x16xf32>, vector<16x64xf32>, vector<16x64xf32> -> vector<16x64xf32>
    %178 = vector.extract_strided_slice %174 {offsets = [16, 0], sizes = [16, 16], strides = [1, 1]} : vector<32x16xf32> to vector<16x16xf32>
    %179 = vector.extract_strided_slice %113 {offsets = [48, 0], sizes = [16, 64], strides = [1, 1]} : vector<64x64xf32> to vector<16x64xf32>
    %cst_82 = arith.constant dense<0.000000e+00> : vector<16x64xf32>
    %180 = tpu.matmul %178, %179, %cst_82 {dimension_numbers = #tpu.dot_dimension_numbers<[1], [0], [0], [1], [0, 0, 1, 1], [], []>} : vector<16x16xf32>, vector<16x64xf32>, vector<16x64xf32> -> vector<16x64xf32>
    %cst_83 = arith.constant 0.000000e+00 : f32
    %181 = vector.broadcast %cst_83 : f32 to vector<16x64xf32>
    %182 = arith.addf %181, %168 : vector<16x64xf32>
    %183 = arith.addf %182, %171 : vector<16x64xf32>
    %184 = arith.addf %183, %177 : vector<16x64xf32>
    %185 = arith.addf %184, %180 : vector<16x64xf32>
    %186 = arith.addf %109, %185 : vector<16x64xf32>
    %187 = arith.mulf %186, %186 : vector<16x64xf32>
    %cst_84 = arith.constant dense<0.000000e+00> : vector<16xf32>
    %188 = vector.multi_reduction <add>, %187, %cst_84 [1] : vector<16x64xf32> to vector<16xf32>
    %189 = vector.shape_cast %188 : vector<16xf32> to vector<16x1xf32>
    %cst_85 = arith.constant 6.400000e+01 : f32
    %190 = vector.broadcast %cst_85 : f32 to vector<16x1xf32>
    %191 = arith.divf %189, %190 : vector<16x1xf32>
    %cst_86 = arith.constant 9.99999974E-6 : f32
    %192 = vector.broadcast %cst_86 : f32 to vector<16x1xf32>
    %193 = arith.addf %191, %192 : vector<16x1xf32>
    %194 = math.rsqrt %193 : vector<16x1xf32>
    %195 = vector.broadcast %194 : vector<16x1xf32> to vector<16x64xf32>
    %196 = arith.mulf %186, %195 : vector<16x64xf32>
    %c1_87 = arith.constant 1 : index
    %c0_88 = arith.constant 0 : index
    %c0_89 = arith.constant 0 : index
    %197 = vector.load %arg6[%c1_87, %c0_88, %c0_89] : memref<2x1x64xf32, #tpu.memory_space<vmem>>, vector<1x1x64xf32>
    %198 = vector.shape_cast %197 : vector<1x1x64xf32> to vector<1x64xf32>
    %199 = vector.broadcast %198 : vector<1x64xf32> to vector<16x64xf32>
    %200 = arith.mulf %196, %199 : vector<16x64xf32>
    %cst_90 = arith.constant dense<0.000000e+00> : vector<16x512xf32>
    %201 = tpu.matmul %200, %115, %cst_90 {dimension_numbers = #tpu.dot_dimension_numbers<[1], [0], [0], [1], [0, 0, 1, 1], [], []>} : vector<16x64xf32>, vector<64x512xf32>, vector<16x512xf32> -> vector<16x512xf32>
    %202 = vector.extract_strided_slice %201 {offsets = [0, 0], sizes = [16, 256], strides = [1, 1]} : vector<16x512xf32> to vector<16x256xf32>
    %203 = vector.extract_strided_slice %201 {offsets = [0, 256], sizes = [16, 256], strides = [1, 1]} : vector<16x512xf32> to vector<16x256xf32>
    %cst_91 = arith.constant 0.000000e+00 : f32
    %204 = vector.broadcast %cst_91 : f32 to vector<16x256xf32>
    %205 = arith.subf %204, %202 : vector<16x256xf32>
    %206 = math.exp %205 : vector<16x256xf32>
    %cst_92 = arith.constant 1.000000e+00 : f32
    %207 = vector.broadcast %cst_92 : f32 to vector<16x256xf32>
    %208 = arith.addf %207, %206 : vector<16x256xf32>
    %cst_93 = arith.constant 1.000000e+00 : f32
    %209 = vector.broadcast %cst_93 : f32 to vector<16x256xf32>
    %210 = arith.divf %209, %208 : vector<16x256xf32>
    %211 = arith.mulf %202, %210 : vector<16x256xf32>
    %212 = arith.mulf %211, %203 : vector<16x256xf32>
    %cst_94 = arith.constant dense<0.000000e+00> : vector<16x64xf32>
    %213 = tpu.matmul %212, %117, %cst_94 {dimension_numbers = #tpu.dot_dimension_numbers<[1], [0], [0], [1], [0, 0, 1, 1], [], []>} : vector<16x256xf32>, vector<256x64xf32>, vector<16x64xf32> -> vector<16x64xf32>
    %214 = arith.addf %186, %213 : vector<16x64xf32>
    %c0_95 = arith.constant 0 : index
    %c0_96 = arith.constant 0 : index
    %215 = vector.load %arg11[%c0_95, %c0_96] : memref<16x64xf32, #tpu.memory_space<vmem>>, vector<16x64xf32>
    tpu.vector_store %arg11[%c0_95, %c0_96], %214 {strides = array<i32>} : memref<16x64xf32, #tpu.memory_space<vmem>>, vector<16x64xf32>,
    return
  }
}

</mosaic_0001>

<bundles_post_ra>
// kernel: tpu_custom_call.1
= control target key start
LH: loop header
LB: loop body
LE: loop exit
PB: predicated region body
PF: predicated region fallthrough
CT: control target
= control target key end

     0   :  { %vm137_vm0 = vcmask 523264   ;;  %s3661_s0 = inlined_call_operand.vmem [shape: f32[16,64], index: 0, kind: input, shape index: {}]   ;;  %s3662_s1 = inlined_call_operand.vmem [shape: f32[2,64,128], index: 1, kind: input, shape index: {}]   ;;  %s3663_s2 = inlined_call_operand.vmem [shape: f32[2,64,64], index: 2, kind: input, shape index: {}]   ;;  %s3664_s3 = inlined_call_operand.vmem [shape: f32[2,64,512], index: 3, kind: input, shape index: {}]   ;;  %s3665_s4 = inlined_call_operand.vmem [shape: f32[2,256,64], index: 4, kind: input, shape index: {}]   ;;  %s3666_s5 = inlined_call_operand.vmem [shape: f32[2,1,64], index: 5, kind: input, shape index: {}]   ;;  %s3667_s6 = inlined_call_operand.vmem [shape: f32[2,1,64], index: 6, kind: input, shape index: {}]   ;;  %s3668_s7 = inlined_call_operand.vmem [shape: f32[16,128], index: 7, kind: input, shape index: {}]   ;;  %s3669_s8 = inlined_call_operand.vmem [shape: f32[16,128], index: 8, kind: input, shape index: {}]   ;;  %s3670_s9 = inlined_call_operand.vmem [shape: f32[16,128], index: 9, kind: input, shape index: {}]   ;;  %s3671_s10 = inlined_call_operand.vmem [shape: f32[64,16], index: 10, kind: input, shape index: {}]   ;;  %s3672_s11 = inlined_call_operand.hbm [shape: f32[16,64], index: 11, kind: output, shape index: {}]  }
   0x1   :  { %v2519_v0 = vld [vmem:[%s3661_s0 + $0x8] sm:$0xff]  ;;  %v2526_v2 = vld [vmem:[%s3661_s0] sm:$0xff] }
   0x2   :  { %v136_v1 = vmul.f32 %v2519_v0, %v2519_v0 }
   0x3   :  { %16 = vsyncpa [#allocation3], 0  ;;  %v135_v4 = vmul.f32 %v2526_v2, %v2526_v2  ;;  %v2444_v6 = vmov 64.0   ;;  %v62_v8 = vld [vmem:[%s3662_s1 + $0x38] sm:$0xff]  ;;  %v61_v9 = vld [vmem:[%s3662_s1 + $0x30] sm:$0xff]  ;;  %s2445_s19 = smov 120  }
   0x4   :  { %v141_v3 = vsel %vm137_vm0, %v136_v1, 0.0  ;;  %2290 = vrcp.f32 %v2444_v6  ;;  %2238 = vmatpush.msra.mxu1 %v62_v8  ;;  %197 = vmatpush.msra.mxu0 %v62_v8  ;;  %v60_v11 = vld [vmem:[%s3662_s1 + $0x28] sm:$0xff]  ;;  %v59_v12 = vld [vmem:[%s3662_s1 + $0x20] sm:$0xff]  ;;  %v58_v14 = vld [vmem:[%s3662_s1 + $0x18] sm:$0xff]  ;;  %s2446_s20 = smov 8   ;;  %s2447_s26 = smov 64  }
   0x5   :  { %142 = vadd.xlane.f32.xlu0 %v141_v3  ;;  %v138_v5 = vsel %vm137_vm0, %v135_v4, 0.0  ;;  %v57_v15 = vld [vmem:[%s3662_s1 + $0x10] sm:$0xff]  ;;  %v56_v17 = vld [vmem:[%s3662_s1 + $0x8] sm:$0xff]  ;;  %v55_v18 = vld [vmem:[%s3662_s1] sm:$0xff]  ;;  %s2448_s12 = smov 112   ;;  %s2449_s15 = smov 48  }
   0x6   :  { %2239 = vmatpush.msra.mxu1 %v61_v9  ;;  %198 = vmatpush.msra.mxu0 %v61_v9  ;;  %v2286_v35 = vld [vmem:[%s3666_s5] ss:$0 sm:$0xff]  ;;  %v44_v59 = vld [vmem:[%s3669_s8 + $0x8] sm:$0xff]  ;;  %s2450_s16 = smov 96   ;;  %s2451_s17 = smov 80   ;;  %vm236_vm8 = vcmask 130048  }
   0x7   :  { %v43_v49 = vld [vmem:[%s3669_s8] sm:$0xff]  ;;  %v42_v60 = vld [vmem:[%s3668_s7 + $0x8] sm:$0xff]  ;;  %s2452_s0 = smov 32   ;;  %s2453_s23 = smov 16  }
   0x8   :  { %2240 = vmatpush.msra.mxu1 %v60_v11  ;;  %199 = vmatpush.msra.mxu0 %v60_v11  ;;  %v41_v50 = vld [vmem:[%s3668_s7] sm:$0xff]  ;;  %v46_v62 = vld [vmem:[%s3670_s9 + $0x8] sm:$0xff] }
   0x9   :  { %v45_v52 = vld [vmem:[%s3670_s9] sm:$0xff] }
   0xa   :  { %v2291_v7 = vpop.eup %2290  ;;  %2241 = vmatpush.msra.mxu1 %v59_v12  ;;  %200 = vmatpush.msra.mxu0 %v59_v12 }
   0xb   :  { %v145_v10 = vmul.f32 64.0, %v2291_v7  ;;  %vm149_vm1 = vweird.f32 %v2291_v7 }
   0xc   :  { %2242 = vmatpush.msra.mxu1 %v58_v14  ;;  %201 = vmatpush.msra.mxu0 %v58_v14 }
   0xd   :  { %139 = vadd.xlane.f32.xlu0 %v138_v5  ;;  %v146_v13 = vsub.f32 1.0, %v145_v10 }
   0xe   :  { %2243 = vmatpush.msra.mxu1 %v57_v15  ;;  %202 = vmatpush.msra.mxu0 %v57_v15 }
   0xf   :  { %v147_v16 = vmul.f32 %v2291_v7, %v146_v13 }
  0x10   :  { %2244 = vmatpush.msra.mxu1 %v56_v17  ;;  %203 = vmatpush.msra.mxu0 %v56_v17 }
  0x11   :  { %v148_v19 = vadd.f32 %v2291_v7, %v147_v16  ;;  %v47_v16 = vld [vmem:[%s3671_s10] sm:$0xff] }
  0x12   :  { %2245 = vmatpush.msra.mxu1 %v55_v18  ;;  %204 = vmatpush.msra.mxu0 %v55_v18 }
  0x13   :  { %v2556_v20 = vsel %vm149_vm1, %v2291_v7, %v148_v19 }
  0x78   :  { %v143_v21 = vpop.xlane.xlu0 %142 }
  0x79   :  { %v152_v22 = vmul.f32 %v2556_v20, %v143_v21 }
  0x7b   :  { %v154_v23 = vadd.f32 1e-05, %v152_v22  ;;  %v51_v22 = vld [vmem:[%s3671_s10 + $0x20] sm:$0xff] }
  0x7d   :  { %2292 = vrsqrt.f32 %v154_v23  ;;  %vm171_vm3 = vweird.f32 %v154_v23 }
  0x80   :  { %v140_v24 = vpop.xlane.xlu0 %139 }
  0x81   :  { %v151_v25 = vmul.f32 %v2556_v20, %v140_v24 }
  0x83   :  { %v2293_v26 = vpop.eup %2292  ;;  %v153_v27 = vadd.f32 1e-05, %v151_v25  ;;  %v48_v25 = vld [vmem:[%s3671_s10 + $0x8] sm:$0xff] }
  0x84   :  { %v166_v28 = vmul.f32 %v2293_v26, %v154_v23  ;;  %vm172_vm2 = vweird.f32 %v2293_v26  ;;  %v49_v23 = vld [vmem:[%s3671_s10 + $0x10] sm:$0xff] }
  0x85   :  { %2294 = vrsqrt.f32 %v153_v27  ;;  %vm173_vm4 = vmor %vm171_vm3, %vm172_vm2  ;;  %vm161_vm5 = vweird.f32 %v153_v27 }
  0x86   :  { %v167_v29 = vmul.f32 %v2293_v26, %v166_v28 }
  0x88   :  { %v168_v30 = vmul.f32 0.5, %v167_v29 }
  0x8a   :  { %v169_v31 = vsub.f32 1.5, %v168_v30 }
  0x8b   :  { %v2295_v32 = vpop.eup %2294 }
  0x8c   :  { %v170_v33 = vmul.f32 %v2293_v26, %v169_v31  ;;  %v156_v34 = vmul.f32 %v2295_v32, %v153_v27  ;;  %vm162_vm6 = vweird.f32 %v2295_v32 }
  0x8d   :  { %vm163_vm7 = vmor %vm161_vm5, %vm162_vm6 }
  0x8e   :  { %v157_v36 = vmul.f32 %v2295_v32, %v156_v34  ;;  %v174_v37 = vsel %vm173_vm4, %v2293_v26, %v170_v33  ;;  %v52_v33 = vld [vmem:[%s3671_s10 + $0x28] sm:$0xff] }
  0x8f   :  { %v176_v38 = vmul.f32 %v174_v37, %v2519_v0  ;;  %v53_v37 = vld [vmem:[%s3671_s10 + $0x30] sm:$0xff] }
  0x90   :  { %v158_v39 = vmul.f32 0.5, %v157_v36 }
  0x91   :  { %v182_v40 = vmul.f32 %v2286_v35, %v176_v38 }
  0x92   :  { %v159_v41 = vsub.f32 1.5, %v158_v39 }
  0x93   :  { %2073 = vmatmul.msk.f32.vlgmr.msra.gmra.mxu1 %vm137_vm0, %v182_v40 }
  0x94   :  { %v160_v42 = vmul.f32 %v2295_v32, %v159_v41 }
  0x96   :  { %v164_v43 = vsel %vm163_vm7, %v2295_v32, %v160_v42 }
  0x97   :  { %v175_v44 = vmul.f32 %v164_v43, %v2526_v2 }
  0x99   :  { %v181_v45 = vmul.f32 %v2286_v35, %v175_v44  ;;  %v50_v35 = vld [vmem:[%s3671_s10 + $0x18] sm:$0xff] }
  0x9b   :  { %2072 = vmatmul.msk.f32.vlgmr.msra.gmra.mxu0 %vm137_vm0, %v181_v45  ;;  %v54_v45 = vld [vmem:[%s3671_s10 + $0x38] sm:$0xff] }
 0x110   :  { %v209_v46 = vpop.f32.mrf.mxu1 }
 0x111   :  { %216 = vrot.lane.b32.xlu1 %v209_v46, %s2445_s19  ;;  %v213_v63 = vmul.f32 %v209_v46, %v42_v60 }
 0x118   :  { %v206_v47 = vpop.f32.mrf.mxu0 }
 0x119   :  { %224 = vrot.lane.b32.xlu1 %v209_v46, %s2446_s20  ;;  %214 = vrot.lane.b32.xlu2 %v206_v47, %s2445_s19  ;;  %v212_v53 = vmul.f32 %v206_v47, %v41_v50 }
 0x121   :  { %222 = vrot.lane.b32.xlu2 %v206_v47, %s2446_s20 }
 0x173   :  { %v215_v48 = vpop.permute.xlu2 %214 }
 0x174   :  { %v218_v51 = vmul.f32 %v215_v48, %v43_v49 }
 0x176   :  { %v220_v55 = vadd.f32 %v218_v51, %v212_v53 }
 0x17b   :  { %v223_v54 = vpop.permute.xlu2 %222 }
 0x17c   :  { %v226_v56 = vmul.f32 %v223_v54, %v45_v52 }
 0x17e   :  { %v2580_v57 = vadd.f32 %v226_v56, %v220_v55 }
 0x180   :  { %232 = vrot.lane.b32.xlu1 %v2580_v57, %s2447_s26 }
 0x183   :  { %v217_v58 = vpop.permute.xlu1 %216 }
 0x184   :  { %v219_v61 = vmul.f32 %v217_v58, %v44_v59 }
 0x186   :  { %v221_v3 = vadd.f32 %v219_v61, %v213_v63 }
 0x188   :  { %268 = vrot.lane.b32.xlu1 %v2580_v57, %s2448_s12 }
 0x18b   :  { %v225_v1 = vpop.permute.xlu1 %224 }
 0x18c   :  { %v227_v4 = vmul.f32 %v225_v1, %v46_v62 }
 0x18e   :  { %v2595_v5 = vadd.f32 %v227_v4, %v221_v3 }
 0x190   :  { %234 = vrot.lane.b32.xlu0 %v2595_v5, %s2447_s26  ;;  %305 = vrot.lane.b32.xlu2 %v2595_v5, %s2449_s15 }
 0x191   :  { %299 = vrot.lane.b32.xlu1 %v2580_v57, %s2450_s16 }
 0x198   :  { %301 = vrot.lane.b32.xlu0 %v2595_v5, %s2450_s16  ;;  %303 = vrot.lane.b32.xlu2 %v2580_v57, %s2449_s15 }
 0x199   :  { %338 = vrot.lane.b32.xlu1 %v2580_v57, %s2451_s17 }
 0x1a0   :  { %270 = vrot.lane.b32.xlu2 %v2595_v5, %s2448_s12 }
 0x1a8   :  { %340 = vrot.lane.b32.xlu2 %v2595_v5, %s2451_s17 }
 0x1ea   :  { %v306_v6 = vpop.permute.xlu2 %305 }
 0x1eb   :  { %2082 = vmatpush.xpose.msk.msra.mxu3 %vm236_vm8, %v306_v6 }
 0x1f2   :  { %v304_v7 = vpop.permute.xlu2 %303  ;;  %v233_v8 = vpop.permute.xlu1 %232 }
 0x1f3   :  { %2083 = vmatpush.xpose.msk.msra.mxu3 %vm236_vm8, %v304_v7 }
 0x1fa   :  { %v269_v9 = vpop.permute.xlu1 %268  ;;  %v271_v13 = vpop.permute.xlu2 %270 }
 0x202   :  { %v235_v10 = vpop.permute.xlu0 %234  ;;  %v341_v15 = vpop.permute.xlu2 %340 }
 0x203   :  { %v300_v11 = vpop.permute.xlu1 %299  ;;  %2074 = vmatpush.xpose.msk.msrb.mxu1 %vm236_vm8, %v235_v10  ;;  %2078 = vmatpush.xpose.msk.msra.mxu2 %vm236_vm8, %v235_v10 }
 0x204   :  { %2084 = vmatmul.msk.f32.vlgmr.msra.gmra.mxu3 %vm236_vm8, %v300_v11 }
 0x207   :  { %2075 = vmatpush.xpose.msk.msrb.mxu1 %vm236_vm8, %v233_v8  ;;  %2079 = vmatpush.xpose.msk.msra.mxu2 %vm236_vm8, %v233_v8 }
 0x20a   :  { %2076 = vmatmul.msk.f32.vlgmr.msrb.gmra.mxu1 %vm236_vm8, %v2580_v57  ;;  %2080 = vmatmul.msk.f32.vlgmr.msra.gmra.mxu2 %vm236_vm8, %v269_v9  ;;  %v302_v12 = vpop.permute.xlu0 %301 }
 0x20b   :  { %2086 = vmatpush.xpose.msk.msra.mxu1 %vm236_vm8, %v306_v6  ;;  %v339_v14 = vpop.permute.xlu1 %338 }
 0x20c   :  { %2085 = vmatmul.msk.f32.gmra.mxu3 %vm236_vm8, %v302_v12 }
 0x20f   :  { %2087 = vmatpush.xpose.msk.msra.mxu1 %vm236_vm8, %v304_v7 }
 0x212   :  { %2077 = vmatmul.msk.f32.gmra.mxu1 %vm236_vm8, %v2595_v5  ;;  %2081 = vmatmul.msk.f32.gmra.mxu2 %vm236_vm8, %v271_v13 }
 0x21a   :  { %2088 = vmatmul.msk.f32.vlgmr.msra.gmra.mxu1 %vm236_vm8, %v339_v14 }
 0x222   :  { %2089 = vmatmul.msk.f32.gmra.mxu1 %vm236_vm8, %v341_v15 }
 0x287   :  { %v262_v17 = vpop.f32.mrf.mxu1  ;;  %v332_v19 = vpop.f32.mrf.mxu3 }
 0x288   :  { %v369_v18 = vadd.f32 %v262_v17, %v47_v16  ;;  %v373_v26 = vadd.f32 %v332_v19, %v51_v22 }
 0x28a   :  { %v377_v21 = vsel %vm236_vm8, %v369_v18, -inf  ;;  %v389_v31 = vsel %vm236_vm8, %v373_v26, -inf }
 0x28b   :  { %378 = vmax.xlane.f32.xlu0 %v377_v21 }
 0x28d   :  { %v293_v24 = vpop.f32.mrf.mxu2 }
 0x28e   :  { %v371_v27 = vadd.f32 %v293_v24, %v49_v23 }
 0x28f   :  { %v265_v28 = vpop.f32.mrf.mxu1  ;;  %v335_v34 = vpop.f32.mrf.mxu3 }
 0x290   :  { %v370_v29 = vadd.f32 %v265_v28, %v48_v25  ;;  %v383_v30 = vsel %vm236_vm8, %v371_v27, -inf  ;;  %v374_v38 = vadd.f32 %v335_v34, %v52_v33 }
 0x291   :  { %384 = vmax.xlane.f32.xlu2 %v383_v30 }
 0x292   :  { %v380_v32 = vsel %vm236_vm8, %v370_v29, -inf  ;;  %v392_v44 = vsel %vm236_vm8, %v374_v38, -inf }
 0x293   :  { %390 = vmax.xlane.f32.xlu0 %v389_v31  ;;  %381 = vmax.xlane.f32.xlu1 %v380_v32 }
 0x295   :  { %v296_v36 = vpop.f32.mrf.mxu2 }
 0x296   :  { %v372_v39 = vadd.f32 %v296_v36, %v50_v35 }
 0x297   :  { %v363_v40 = vpop.f32.mrf.mxu1 }
 0x298   :  { %v375_v41 = vadd.f32 %v363_v40, %v53_v37  ;;  %v386_v42 = vsel %vm236_vm8, %v372_v39, -inf }
 0x299   :  { %387 = vmax.xlane.f32.xlu2 %v386_v42 }
 0x29a   :  { %v395_v43 = vsel %vm236_vm8, %v375_v41, -inf }
 0x29b   :  { %396 = vmax.xlane.f32.xlu0 %v395_v43  ;;  %393 = vmax.xlane.f32.xlu1 %v392_v44 }
 0x29f   :  { %v366_v46 = vpop.f32.mrf.mxu1 }
 0x2a0   :  { %v376_v47 = vadd.f32 %v366_v46, %v54_v45 }
 0x2a2   :  { %v398_v48 = vsel %vm236_vm8, %v376_v47, -inf }
 0x2a3   :  { %399 = vmax.xlane.f32.xlu2 %v398_v48 }
 0x2fe   :  { %v379_v49 = vpop.xlane.xlu0 %378 }
 0x2ff   :  { %v401_v50 = vsub.f32 %v369_v18, %v379_v49 }
 0x301   :  { %v409_v51 = vmul.f32 1.442695, %v401_v50 }
 0x303   :  { %2296 = vpow2.f32 %v409_v51 }
 0x304   :  { %v385_v52 = vpop.xlane.xlu2 %384 }
 0x305   :  { %v403_v53 = vsub.f32 %v371_v27, %v385_v52  ;;  %v2266_v27 = vpack.i.bf16 %v2580_v57, %v2595_v5 }
 0x306   :  { %v382_v54 = vpop.xlane.xlu1 %381  ;;  %v391_v55 = vpop.xlane.xlu0 %390 }
 0x307   :  { %v413_v56 = vmul.f32 1.442695, %v403_v53  ;;  %v405_v58 = vsub.f32 %v373_v26, %v391_v55  ;;  %v402_v61 = vsub.f32 %v370_v29, %v382_v54 }
 0x309   :  { %v2663_v59 = vpop.eup %2296  ;;  %2298 = vpow2.f32 %v413_v56  ;;  %v417_v60 = vmul.f32 1.442695, %v405_v58  ;;  %v411_v3 = vmul.f32 1.442695, %v402_v61 }
 0x30a   :  { %v425_v62 = vsel %vm236_vm8, %v2663_v59, 0.0 }
 0x30b   :  { %426 = vadd.xlane.f32.xlu1 %v425_v62  ;;  %2300 = vpow2.f32 %v417_v60 }
 0x30c   :  { %v388_v63 = vpop.xlane.xlu2 %387 }
 0x30d   :  { %v404_v1 = vsub.f32 %v372_v39, %v388_v63 }
 0x30e   :  { %v397_v4 = vpop.xlane.xlu0 %396  ;;  %v394_v8 = vpop.xlane.xlu1 %393 }
 0x30f   :  { %v2667_v6 = vpop.eup %2298  ;;  %v415_v7 = vmul.f32 1.442695, %v404_v1  ;;  %v407_v9 = vsub.f32 %v375_v41, %v397_v4  ;;  %v406_v12 = vsub.f32 %v374_v38, %v394_v8 }
 0x310   :  { %v431_v10 = vsel %vm236_vm8, %v2667_v6, 0.0 }
 0x311   :  { %2302 = vpow2.f32 %v415_v7  ;;  %432 = vadd.xlane.f32.xlu2 %v431_v10  ;;  %v2671_v11 = vpop.eup %2300  ;;  %v421_v13 = vmul.f32 1.442695, %v407_v9  ;;  %v419_v15 = vmul.f32 1.442695, %v406_v12 }
 0x312   :  { %2304 = vpow2.f32 %v411_v3  ;;  %v437_v14 = vsel %vm236_vm8, %v2671_v11, 0.0 }
 0x313   :  { %438 = vadd.xlane.f32.xlu0 %v437_v14  ;;  %2306 = vpow2.f32 %v421_v13 }
 0x314   :  { %2308 = vpow2.f32 %v419_v15 }
 0x316   :  { %v400_v16 = vpop.xlane.xlu2 %399 }
 0x317   :  { %v2675_v17 = vpop.eup %2302  ;;  %v408_v18 = vsub.f32 %v376_v47, %v400_v16 }
 0x318   :  { %v2677_v19 = vpop.eup %2304  ;;  %v434_v21 = vsel %vm236_vm8, %v2675_v17, 0.0 }
 0x319   :  { %435 = vadd.xlane.f32.xlu2 %v434_v21  ;;  %v423_v22 = vmul.f32 1.442695, %v408_v18  ;;  %v428_v23 = vsel %vm236_vm8, %v2677_v19, 0.0  ;;  %v2683_v24 = vpop.eup %2306 }
 0x31a   :  { %v2685_v25 = vpop.eup %2308  ;;  %v443_v26 = vsel %vm236_vm8, %v2683_v24, 0.0 }
 0x31b   :  { %429 = vadd.xlane.f32.xlu0 %v428_v23  ;;  %2310 = vpow2.f32 %v423_v22  ;;  %v440_v28 = vsel %vm236_vm8, %v2685_v25, 0.0  ;;  %v64_v22 = vld [vmem:[%s3663_s2 + $0x8] sm:$0xff] }
 0x321   :  { %444 = vadd.xlane.f32.xlu2 %v443_v26  ;;  %v2694_v29 = vpop.eup %2310 }
 0x322   :  { %v446_v30 = vsel %vm236_vm8, %v2694_v29, 0.0 }
 0x323   :  { %441 = vadd.xlane.f32.xlu0 %v440_v28 }
 0x324   :  { %2267 = vrot.lane.b32.xlu1 %v2266_v27, %s2452_s0 }
 0x329   :  { %447 = vadd.xlane.f32.xlu2 %v446_v30 }
 0x337   :  { %2272 = vrot.lane.b32.xlu0 %v2266_v27, %s2453_s23 }
 0x37e   :  { %v427_v31 = vpop.xlane.xlu1 %426 }
 0x37f   :  { %2312 = vrcp.f32 %v427_v31  ;;  %v460_v40 = vand.u32 2147483648, %v427_v31  ;;  %vm454_vm10 = vweird.f32 %v427_v31  ;;  %v458_v41 = vand.u32 2147483647, %v427_v31 }
 0x381   :  { %v461_v45 = vor.u32 1.1754944e-38, %v460_v40  ;;  %vm459_vm12 = vcmp.eq.f32.partialorder %v458_v41, 8.507059e+37 }
 0x384   :  { %v2699_v5 = vpop.xlane.xlu2 %432 }
 0x385   :  { %v2313_v32 = vpop.eup %2312  ;;  %2314 = vrcp.f32 %v2699_v5  ;;  %v490_v16 = vand.u32 2147483648, %v2699_v5  ;;  %vm484_vm3 = vweird.f32 %v2699_v5  ;;  %v488_v21 = vand.u32 2147483647, %v2699_v5 }
 0x386   :  { %v450_v57 = vmul.f32 %v2313_v32, %v427_v31  ;;  %v2701_v33 = vpop.xlane.xlu0 %438  ;;  %vm455_vm9 = vweird.f32 %v2313_v32 }
 0x387   :  { %2316 = vrcp.f32 %v2701_v33  ;;  %vm456_vm11 = vmor %vm454_vm10, %vm455_vm9  ;;  %v491_v31 = vor.u32 1.1754944e-38, %v490_v16  ;;  %vm514_vm6 = vweird.f32 %v2701_v33  ;;  %vm489_vm7 = vcmp.eq.f32.partialorder %v488_v21, 8.507059e+37  ;;  %v66_v21 = vld [vmem:[%s3663_s2 + $0x18] sm:$0xff] }
 0x388   :  { %v451_v34 = vsub.f32 1.0, %v450_v57  ;;  %v518_v57 = vand.u32 2147483647, %v2701_v33  ;;  %636 = vmatpush.msrb.mxu3 %v66_v21  ;;  %v72_v21 = vld [vmem:[%s3664_s3 + $0x8] sm:$0xff] }
 0x38a   :  { %v452_v35 = vmul.f32 %v2313_v32, %v451_v34 }
 0x38b   :  { %v2705_v37 = vpop.eup %2314 }
 0x38c   :  { %v453_v38 = vadd.f32 %v2313_v32, %v452_v35  ;;  %v2707_v39 = vpop.xlane.xlu2 %435  ;;  %v480_v42 = vmul.f32 %v2705_v37, %v2699_v5  ;;  %vm485_vm1 = vweird.f32 %v2705_v37 }
 0x38d   :  { %v2712_v44 = vpop.eup %2316  ;;  %vm2741_vm5 = vmor %vm484_vm3, %vm485_vm1  ;;  %v505_v40 = vand.u32 2147483648, %v2707_v39 }
 0x38e   :  { %v430_v36 = vpop.xlane.xlu0 %429  ;;  %v457_v43 = vsel %vm456_vm11, %v2313_v32, %v453_v38  ;;  %v481_v48 = vsub.f32 1.0, %v480_v42  ;;  %v510_v53 = vmul.f32 %v2712_v44, %v2701_v33  ;;  %vm515_vm4 = vweird.f32 %v2712_v44 }
 0x38f   :  { %2318 = vrcp.f32 %v430_v36  ;;  %v462_v52 = vsel %vm459_vm12, %v461_v45, %v457_v43  ;;  %v475_v58 = vand.u32 2147483648, %v430_v36  ;;  %v473_v1 = vand.u32 2147483647, %v430_v36  ;;  %vm2758_vm9 = vmor %vm514_vm6, %vm515_vm4 }
 0x390   :  { %2320 = vrcp.f32 %v2707_v39  ;;  %v463_v61 = vmul.f32 %v2663_v59, %v462_v52  ;;  %v482_v62 = vmul.f32 %v2705_v37, %v481_v48  ;;  %v511_v3 = vsub.f32 1.0, %v510_v53 }
 0x391   :  { %vm469_vm14 = vweird.f32 %v430_v36  ;;  %v476_v9 = vor.u32 1.1754944e-38, %v475_v58  ;;  %vm474_vm2 = vcmp.eq.f32.partialorder %v473_v1, 8.507059e+37  ;;  %v520_v32 = vand.u32 2147483648, %v2701_v33 }
 0x392   :  { %v483_v10 = vadd.f32 %v2705_v37, %v482_v62  ;;  %v512_v12 = vmul.f32 %v2712_v44, %v511_v3  ;;  %vm519_vm11 = vcmp.eq.f32.partialorder %v518_v57, 8.507059e+37  ;;  %vm499_vm12 = vweird.f32 %v2707_v39 }
 0x393   :  { %v521_v38 = vor.u32 1.1754944e-38, %v520_v32  ;;  %v503_v43 = vand.u32 2147483647, %v2707_v39 }
 0x394   :  { %v2721_v60 = vpop.xlane.xlu2 %444  ;;  %v513_v23 = vadd.f32 %v2712_v44, %v512_v12 }
 0x395   :  { %v2319_v46 = vpop.eup %2318  ;;  %vm504_vm1 = vcmp.eq.f32.partialorder %v503_v43, 8.507059e+37  ;;  %v550_v3 = vand.u32 2147483648, %v2721_v60 }
 0x396   :  { %v2268_v47 = vpop.permute.xlu1 %2267  ;;  %v465_v49 = vmul.f32 %v2319_v46, %v430_v36  ;;  %v2714_v50 = vpop.xlane.xlu0 %441  ;;  %vm470_vm13 = vweird.f32 %v2319_v46 }
 0x397   :  { %v2269_v51 = vunpack.i.l.bf16 %v2268_v47  ;;  %2322 = vrcp.f32 %v2714_v50  ;;  %v2719_v54 = vpop.eup %2320  ;;  %v2270_v56 = vunpack.i.h.bf16 %v2268_v47  ;;  %vm471_vm15 = vmor %vm469_vm14, %vm470_vm13 }
 0x398   :  { %v466_v55 = vsub.f32 1.0, %v465_v49  ;;  %v495_v4 = vmul.f32 %v2719_v54, %v2707_v39  ;;  %2324 = vrcp.f32 %v2721_v60  ;;  %vm500_vm10 = vweird.f32 %v2719_v54 }
 0x399   :  { %601 = vmatpush.msrb.mxu2 %v2269_v51  ;;  %vm2775_vm13 = vmor %vm499_vm12, %vm500_vm10  ;;  %v506_v51 = vor.u32 1.1754944e-38, %v505_v40  ;;  %v535_v39 = vand.u32 2147483648, %v2714_v50 }
 0x39a   :  { %v467_v63 = vmul.f32 %v2319_v46, %v466_v55  ;;  %v496_v13 = vsub.f32 1.0, %v495_v4  ;;  %v533_v55 = vand.u32 2147483647, %v2714_v50 }
 0x39b   :  { %602 = vmatpush.msrb.mxu2 %v2270_v56  ;;  %v536_v62 = vor.u32 1.1754944e-38, %v535_v39 }
 0x39c   :  { %2090 = vmatmul.msk.f32.vlgmr.msrb.gmra.mxu2 %vm236_vm8, %v463_v61  ;;  %v468_v7 = vadd.f32 %v2319_v46, %v467_v63  ;;  %v497_v26 = vmul.f32 %v2719_v54, %v496_v13  ;;  %v2747_v28 = vpop.xlane.xlu2 %447  ;;  %vm534_vm3 = vcmp.eq.f32.partialorder %v533_v55, 8.507059e+37  ;;  %v100_v55 = vld [vmem:[%s3664_s3 + $0xe8] sm:$0xff] }
 0x39d   :  { %v2728_v8 = vpop.eup %2322  ;;  %2326 = vrcp.f32 %v2747_v28  ;;  %v565_v12 = vand.u32 2147483648, %v2747_v28  ;;  %vm559_vm10 = vweird.f32 %v2747_v28 }
 0x39e   :  { %v472_v59 = vsel %vm471_vm15, %v2319_v46, %v468_v7  ;;  %v525_v14 = vmul.f32 %v2728_v8, %v2714_v50  ;;  %v2753_v30 = vpop.eup %2324  ;;  %v498_v33 = vadd.f32 %v2719_v54, %v497_v26  ;;  %vm530_vm14 = vweird.f32 %v2728_v8  ;;  %v70_v26 = vld [vmem:[%s3663_s2 + $0x38] sm:$0xff] }
 0x39f   :  { %v477_v15 = vsel %vm474_vm2, %v476_v9, %v472_v59  ;;  %v540_v35 = vmul.f32 %v2753_v30, %v2721_v60  ;;  %vm529_vm15 = vweird.f32 %v2714_v50  ;;  %vm545_vm4 = vweird.f32 %v2753_v30 }
 0x3a0   :  { %v478_v18 = vmul.f32 %v2677_v19, %v477_v15  ;;  %v526_v27 = vsub.f32 1.0, %v525_v14  ;;  %v487_v19 = vsel %vm2741_vm5, %v2705_v37, %v483_v10  ;;  %v517_v37 = vsel %vm2758_vm9, %v2712_v44, %v513_v23  ;;  %vm531_vm2 = vmor %vm529_vm15, %vm530_vm14  ;;  %v63_v23 = vld [vmem:[%s3663_s2] sm:$0xff] }
 0x3a1   :  { %v492_v34 = vsel %vm489_vm7, %v491_v31, %v487_v19  ;;  %v522_v46 = vsel %vm519_vm11, %v521_v38, %v517_v37  ;;  %v541_v44 = vsub.f32 1.0, %v540_v35  ;;  %v502_v48 = vsel %vm2775_vm13, %v2719_v54, %v498_v33 }
 0x3a2   :  { %v527_v36 = vmul.f32 %v2728_v8, %v526_v27  ;;  %v493_v42 = vmul.f32 %v2667_v6, %v492_v34  ;;  %v523_v53 = vmul.f32 %v2671_v11, %v522_v46  ;;  %v507_v56 = vsel %vm504_vm1, %v506_v51, %v502_v48  ;;  %v69_v27 = vld [vmem:[%s3663_s2 + $0x30] sm:$0xff] }
 0x3a3   :  { %v2327_v6 = vpop.eup %2326  ;;  %v542_v54 = vmul.f32 %v2753_v30, %v541_v44  ;;  %v508_v63 = vmul.f32 %v2675_v17, %v507_v56  ;;  %vm544_vm5 = vweird.f32 %v2721_v60  ;;  %v548_v7 = vand.u32 2147483647, %v2721_v60  ;;  %v101_v56 = vld [vmem:[%s3664_s3 + $0xf0] sm:$0xff] }
 0x3a4   :  { %2091 = vmatmul.msk.f32.gmra.mxu2 %vm236_vm8, %v478_v18  ;;  %v528_v49 = vadd.f32 %v2728_v8, %v527_v36  ;;  %v555_v58 = vmul.f32 %v2327_v6, %v2747_v28  ;;  %vm546_vm6 = vmor %vm544_vm5, %vm545_vm4  ;;  %v551_v9 = vor.u32 1.1754944e-38, %v550_v3  ;;  %vm560_vm9 = vweird.f32 %v2327_v6  ;;  %v68_v18 = vld [vmem:[%s3663_s2 + $0x28] sm:$0xff]  ;;  %v87_v3 = vld [vmem:[%s3664_s3 + $0x80] sm:$0xff] }
 0x3a5   :  { %v543_v50 = vadd.f32 %v2753_v30, %v542_v54  ;;  %vm549_vm7 = vcmp.eq.f32.partialorder %v548_v7, 8.507059e+37  ;;  %vm561_vm11 = vmor %vm559_vm10, %vm560_vm9  ;;  %v566_v14 = vor.u32 1.1754944e-38, %v565_v12  ;;  %712 = vmatpush.msrb.mxu1 %v68_v18  ;;  %v95_v54 = vld [vmem:[%s3664_s3 + $0xc0] sm:$0xff]  ;;  %v89_v7 = vld [vmem:[%s3664_s3 + $0x90] sm:$0xff] }
 0x3a6   :  { %v532_v61 = vsel %vm531_vm2, %v2728_v8, %v528_v49  ;;  %v556_v11 = vsub.f32 1.0, %v555_v58  ;;  %v96_v58 = vld [vmem:[%s3664_s3 + $0xc8] sm:$0xff]  ;;  %v79_v12 = vld [vmem:[%s3664_s3 + $0x40] sm:$0xff]  ;;  %v78_v18 = vld [vmem:[%s3664_s3 + $0x38] sm:$0xff] }
 0x3a7   :  { %v537_v1 = vsel %vm534_vm3, %v536_v62, %v532_v61  ;;  %v547_v17 = vsel %vm546_vm6, %v2753_v30, %v543_v50  ;;  %v97_v61 = vld [vmem:[%s3664_s3 + $0xd0] sm:$0xff]  ;;  %v98_v62 = vld [vmem:[%s3664_s3 + $0xd8] sm:$0xff] }
 0x3a8   :  { %v538_v4 = vmul.f32 %v2685_v25, %v537_v1  ;;  %v557_v8 = vmul.f32 %v2327_v6, %v556_v11  ;;  %v552_v59 = vsel %vm549_vm7, %v551_v9, %v547_v17  ;;  %v563_v25 = vand.u32 2147483647, %v2747_v28  ;;  %v92_v1 = vld [vmem:[%s3664_s3 + $0xa8] sm:$0xff]  ;;  %v93_v11 = vld [vmem:[%s3664_s3 + $0xb0] sm:$0xff]  ;;  %v94_v50 = vld [vmem:[%s3664_s3 + $0xb8] sm:$0xff] }
 0x3a9   :  { %v2273_v41 = vpop.permute.xlu0 %2272  ;;  %v553_v13 = vmul.f32 %v2683_v24, %v552_v59  ;;  %v67_v24 = vld [vmem:[%s3663_s2 + $0x20] sm:$0xff]  ;;  %v84_v9 = vld [vmem:[%s3664_s3 + $0x68] sm:$0xff]  ;;  %v85_v59 = vld [vmem:[%s3664_s3 + $0x70] sm:$0xff] }
 0x3aa   :  { %v2274_v45 = vunpack.i.l.bf16 %v2273_v41  ;;  %v2275_v52 = vunpack.i.h.bf16 %v2273_v41  ;;  %v558_v10 = vadd.f32 %v2327_v6, %v557_v8  ;;  %vm564_vm12 = vcmp.eq.f32.partialorder %v563_v25, 8.507059e+37  ;;  %713 = vmatpush.msrb.mxu1 %v67_v24  ;;  %v90_v8 = vld [vmem:[%s3664_s3 + $0x98] sm:$0xff]  ;;  %v83_v17 = vld [vmem:[%s3664_s3 + $0x60] sm:$0xff]  ;;  %v81_v25 = vld [vmem:[%s3664_s3 + $0x50] sm:$0xff] }
 0x3ab   :  { %v71_v24 = vld [vmem:[%s3664_s3] sm:$0xff] }
 0x3ac   :  { %2092 = vmatmul.msk.f32.gmra.mxu2 %vm236_vm8, %v493_v42  ;;  %677 = vmatpush.msrb.mxu0 %v2274_v45  ;;  %v562_v60 = vsel %vm561_vm11, %v2327_v6, %v558_v10  ;;  %v86_v10 = vld [vmem:[%s3664_s3 + $0x78] sm:$0xff] }
 0x3ad   :  { %v567_v15 = vsel %vm564_vm12, %v566_v14, %v562_v60  ;;  %770 = vmatpush.msra.mxu1 %v64_v22  ;;  %v82_v60 = vld [vmem:[%s3664_s3 + $0x58] sm:$0xff]  ;;  %v75_v14 = vld [vmem:[%s3664_s3 + $0x20] sm:$0xff] }
 0x3ae   :  { %678 = vmatpush.msrb.mxu0 %v2275_v52  ;;  %v568_v16 = vmul.f32 %v2694_v29, %v567_v15  ;;  %v65_v29 = vld [vmem:[%s3663_s2 + $0x10] sm:$0xff]  ;;  %v76_v15 = vld [vmem:[%s3664_s3 + $0x28] sm:$0xff]  ;;  %v74_v22 = vld [vmem:[%s3664_s3 + $0x18] sm:$0xff] }
 0x3af   :  { %2096 = vmatmul.msk.f32.vlgmr.msrb.gmra.mxu0 %vm236_vm8, %v523_v53  ;;  %637 = vmatpush.msrb.mxu3 %v65_v29  ;;  %v73_v29 = vld [vmem:[%s3664_s3 + $0x10] sm:$0xff] }
 0x3b0   :  { %771 = vmatpush.msra.mxu1 %v63_v23  ;;  %885 = vmatpush.msra.mxu0 %v101_v56  ;;  %v115_v56 = vld [vmem:[%s3665_s4 + $0x60] sm:$0xff] }
 0x3b1   :  { %741 = vmatpush.msra.mxu3 %v70_v26 }
 0x3b2   :  { %886 = vmatpush.msra.mxu0 %v97_v61  ;;  %v113_v61 = vld [vmem:[%s3665_s4 + $0x50] sm:$0xff] }
 0x3b3   :  { %742 = vmatpush.msra.mxu3 %v69_v27 }
 0x3b4   :  { %2093 = vmatmul.msk.f32.gmra.mxu2 %vm236_vm8, %v508_v63  ;;  %v91_v63 = vld [vmem:[%s3664_s3 + $0xa0] sm:$0xff]  ;;  %887 = vmatpush.msra.mxu0 %v93_v11 }
 0x3b5   :  { %v111_v11 = vld [vmem:[%s3665_s4 + $0x40] sm:$0xff] }
 0x3b6   :  { %888 = vmatpush.msra.mxu0 %v89_v7  ;;  %v109_v7 = vld [vmem:[%s3665_s4 + $0x30] sm:$0xff] }
 0x3b7   :  { %2097 = vmatmul.msk.f32.gmra.mxu0 %vm236_vm8, %v538_v4  ;;  %v88_v4 = vld [vmem:[%s3664_s3 + $0x88] sm:$0xff] }
 0x3b8   :  { %889 = vmatpush.msra.mxu0 %v85_v59  ;;  %v107_v59 = vld [vmem:[%s3665_s4 + $0x20] sm:$0xff] }
 0x3ba   :  { %890 = vmatpush.msra.mxu0 %v81_v25 }
 0x3bf   :  { %2098 = vmatmul.msk.f32.gmra.mxu0 %vm236_vm8, %v553_v13  ;;  %v80_v13 = vld [vmem:[%s3664_s3 + $0x48] sm:$0xff] }
 0x3c7   :  { %2099 = vmatmul.msk.f32.gmra.mxu0 %vm236_vm8, %v568_v16  ;;  %v77_v16 = vld [vmem:[%s3664_s3 + $0x30] sm:$0xff] }
 0x3c8   :  { %891 = vmatpush.msra.mxu0 %v77_v16  ;;  %v105_v16 = vld [vmem:[%s3665_s4 + $0x10] sm:$0xff] }
 0x3ca   :  { %892 = vmatpush.msra.mxu0 %v73_v29  ;;  %v104_v29 = vld [vmem:[%s3665_s4 + $0x8] sm:$0xff] }
 0x41f   :  { %v604_v28 = vpop.f32.mrf.mxu2 }
 0x427   :  { %v607_v19 = vpop.f32.mrf.mxu2 }
 0x42c   :  { %v680_v30 = vpop.f32.mrf.mxu0 }
 0x42d   :  { %2100 = vmatmul.msk.f32.vlgmr.msrb.gmra.mxu1 %vm236_vm8, %v680_v30 }
 0x42f   :  { %v610_v31 = vpop.f32.mrf.mxu2 }
 0x430   :  { %2094 = vmatmul.msk.f32.vlgmr.msrb.gmra.mxu3 %vm236_vm8, %v610_v31 }
 0x431   :  { %862 = vmatpush.msrb.mxu3 %v100_v55  ;;  %v132_v55 = vld [vmem:[%s3665_s4 + $0xe8] sm:$0xff] }
 0x433   :  { %863 = vmatpush.msrb.mxu3 %v96_v58  ;;  %v130_v58 = vld [vmem:[%s3665_s4 + $0xd8] sm:$0xff] }
 0x434   :  { %v683_v32 = vpop.f32.mrf.mxu0 }
 0x435   :  { %2101 = vmatmul.msk.f32.gmra.mxu1 %vm236_vm8, %v683_v32  ;;  %864 = vmatpush.msrb.mxu3 %v92_v1  ;;  %v128_v1 = vld [vmem:[%s3665_s4 + $0xc8] sm:$0xff] }
 0x437   :  { %v613_v57 = vpop.f32.mrf.mxu2  ;;  %865 = vmatpush.msrb.mxu3 %v88_v4  ;;  %v126_v4 = vld [vmem:[%s3665_s4 + $0xb8] sm:$0xff] }
 0x438   :  { %2095 = vmatmul.msk.f32.gmra.mxu3 %vm236_vm8, %v613_v57 }
 0x439   :  { %866 = vmatpush.msrb.mxu3 %v84_v9  ;;  %v124_v9 = vld [vmem:[%s3665_s4 + $0xa8] sm:$0xff] }
 0x43b   :  { %867 = vmatpush.msrb.mxu3 %v80_v13  ;;  %v122_v13 = vld [vmem:[%s3665_s4 + $0x98] sm:$0xff] }
 0x43c   :  { %v686_v5 = vpop.f32.mrf.mxu0 }
 0x43d   :  { %2104 = vmatmul.msk.f32.vlgmr.msra.gmra.mxu1 %vm236_vm8, %v604_v28  ;;  %868 = vmatpush.msrb.mxu3 %v76_v15 }
 0x43f   :  { %869 = vmatpush.msrb.mxu3 %v72_v21 }
 0x440   :  { %2102 = vmatmul.msk.f32.vlgmr.msra.gmra.mxu3 %vm236_vm8, %v686_v5 }
 0x444   :  { %v689_v34 = vpop.f32.mrf.mxu0 }
 0x445   :  { %2105 = vmatmul.msk.f32.gmra.mxu1 %vm236_vm8, %v607_v19 }
 0x448   :  { %2103 = vmatmul.msk.f32.gmra.mxu3 %vm236_vm8, %v689_v34 }
 0x4aa   :  { %v715_v35 = vpop.f32.mrf.mxu1 }
 0x4b2   :  { %v718_v36 = vpop.f32.mrf.mxu1 }
 0x4b3   :  { %v639_v37 = vpop.f32.mrf.mxu3 }
 0x4ba   :  { %v773_v33 = vpop.f32.mrf.mxu1 }
 0x4bb   :  { %v642_v38 = vpop.f32.mrf.mxu3  ;;  %v774_v40 = vadd.f32 %v773_v33, %v639_v37  ;;  %v2287_v33 = vld [vmem:[%s3667_s6] ss:$0 sm:$0xff] }
 0x4bd   :  { %v779_v41 = vadd.f32 %v774_v40, %v715_v35 }
 0x4c2   :  { %v776_v42 = vpop.f32.mrf.mxu1 }
 0x4c3   :  { %v744_v43 = vpop.f32.mrf.mxu3  ;;  %v777_v46 = vadd.f32 %v776_v42, %v642_v38 }
 0x4c4   :  { %v781_v45 = vadd.f32 %v779_v41, %v744_v43 }
 0x4c5   :  { %v780_v49 = vadd.f32 %v777_v46, %v718_v36 }
 0x4c6   :  { %v2843_v47 = vadd.f32 %v781_v45, %v2526_v2  ;;  %v99_v2 = vld [vmem:[%s3664_s3 + $0xe0] sm:$0xff] }
 0x4c7   :  { %839 = vmatpush.msra.mxu2 %v99_v2  ;;  %v116_v2 = vld [vmem:[%s3665_s4 + $0x68] sm:$0xff] }
 0x4c8   :  { %v785_v44 = vmul.f32 %v2843_v47, %v2843_v47 }
 0x4c9   :  { %840 = vmatpush.msra.mxu2 %v95_v54  ;;  %v114_v54 = vld [vmem:[%s3665_s4 + $0x58] sm:$0xff] }
 0x4ca   :  { %v787_v48 = vsel %vm137_vm0, %v785_v44, 0.0 }
 0x4cb   :  { %788 = vadd.xlane.f32.xlu1 %v787_v48  ;;  %v747_v6 = vpop.f32.mrf.mxu3  ;;  %841 = vmatpush.msra.mxu2 %v91_v63  ;;  %v112_v63 = vld [vmem:[%s3665_s4 + $0x48] sm:$0xff] }
 0x4cc   :  { %v782_v51 = vadd.f32 %v780_v49, %v747_v6  ;;  %v118_v6 = vld [vmem:[%s3665_s4 + $0x78] sm:$0xff] }
 0x4cd   :  { %842 = vmatpush.msra.mxu2 %v87_v3  ;;  %v110_v3 = vld [vmem:[%s3665_s4 + $0x38] sm:$0xff] }
 0x4ce   :  { %v2849_v39 = vadd.f32 %v782_v51, %v2519_v0  ;;  %v102_v0 = vld [vmem:[%s3664_s3 + $0xf8] sm:$0xff] }
 0x4cf   :  { %908 = vmatpush.msrb.mxu1 %v102_v0  ;;  %843 = vmatpush.msra.mxu2 %v83_v17  ;;  %v134_v51 = vld [vmem:[%s3665_s4 + $0xf8] sm:$0xff]  ;;  %v131_v0 = vld [vmem:[%s3665_s4 + $0xe0] sm:$0xff]  ;;  %v108_v17 = vld [vmem:[%s3665_s4 + $0x28] sm:$0xff] }
 0x4d0   :  { %v786_v52 = vmul.f32 %v2849_v39, %v2849_v39  ;;  %1030 = vmatpush.msra.mxu3 %v134_v51 }
 0x4d1   :  { %909 = vmatpush.msrb.mxu1 %v98_v62  ;;  %844 = vmatpush.msra.mxu2 %v79_v12  ;;  %v129_v62 = vld [vmem:[%s3665_s4 + $0xd0] sm:$0xff]  ;;  %v106_v12 = vld [vmem:[%s3665_s4 + $0x18] sm:$0xff] }
 0x4d2   :  { %v790_v53 = vsel %vm137_vm0, %v786_v52, 0.0  ;;  %v117_v52 = vld [vmem:[%s3665_s4 + $0x70] sm:$0xff] }
 0x4d3   :  { %791 = vadd.xlane.f32.xlu2 %v790_v53  ;;  %910 = vmatpush.msrb.mxu1 %v94_v50  ;;  %v133_v53 = vld [vmem:[%s3665_s4 + $0xf0] sm:$0xff]  ;;  %v127_v50 = vld [vmem:[%s3665_s4 + $0xc0] sm:$0xff] }
 0x4d4   :  { %845 = vmatpush.msra.mxu2 %v75_v14  ;;  %1031 = vmatpush.msra.mxu3 %v133_v53 }
 0x4d5   :  { %911 = vmatpush.msrb.mxu1 %v90_v8  ;;  %v125_v8 = vld [vmem:[%s3665_s4 + $0xb0] sm:$0xff] }
 0x4d6   :  { %846 = vmatpush.msra.mxu2 %v71_v24  ;;  %1032 = vmatpush.msra.mxu3 %v132_v55 }
 0x4d7   :  { %912 = vmatpush.msrb.mxu1 %v86_v10  ;;  %v123_v10 = vld [vmem:[%s3665_s4 + $0xa0] sm:$0xff] }
 0x4d8   :  { %1007 = vmatpush.msrb.mxu2 %v118_v6  ;;  %1033 = vmatpush.msra.mxu3 %v131_v0 }
 0x4d9   :  { %913 = vmatpush.msrb.mxu1 %v82_v60 }
 0x4da   :  { %1008 = vmatpush.msrb.mxu2 %v117_v52  ;;  %1034 = vmatpush.msra.mxu3 %v130_v58 }
 0x4db   :  { %914 = vmatpush.msrb.mxu1 %v78_v18  ;;  %v121_v18 = vld [vmem:[%s3665_s4 + $0x90] sm:$0xff] }
 0x4dc   :  { %1009 = vmatpush.msrb.mxu2 %v116_v2  ;;  %1035 = vmatpush.msra.mxu3 %v129_v62 }
 0x4dd   :  { %915 = vmatpush.msrb.mxu1 %v74_v22  ;;  %v120_v22 = vld [vmem:[%s3665_s4 + $0x88] sm:$0xff] }
 0x4de   :  { %1010 = vmatpush.msrb.mxu2 %v115_v56  ;;  %1036 = vmatpush.msra.mxu3 %v128_v1 }
 0x4e0   :  { %1011 = vmatpush.msrb.mxu2 %v114_v54  ;;  %1037 = vmatpush.msra.mxu3 %v127_v50 }
 0x4e2   :  { %1012 = vmatpush.msrb.mxu2 %v113_v61  ;;  %1038 = vmatpush.msra.mxu3 %v126_v4 }
 0x4e4   :  { %1013 = vmatpush.msrb.mxu2 %v112_v63  ;;  %1039 = vmatpush.msra.mxu3 %v125_v8 }
 0x4e6   :  { %1014 = vmatpush.msrb.mxu2 %v111_v11  ;;  %1040 = vmatpush.msra.mxu3 %v124_v9 }
 0x4e8   :  { %1015 = vmatpush.msrb.mxu2 %v110_v3  ;;  %1041 = vmatpush.msra.mxu3 %v123_v10 }
 0x4ea   :  { %1016 = vmatpush.msrb.mxu2 %v109_v7  ;;  %1042 = vmatpush.msra.mxu3 %v122_v13 }
 0x4ec   :  { %1017 = vmatpush.msrb.mxu2 %v108_v17  ;;  %1043 = vmatpush.msra.mxu3 %v121_v18 }
 0x4ee   :  { %1018 = vmatpush.msrb.mxu2 %v107_v59  ;;  %1044 = vmatpush.msra.mxu3 %v120_v22 }
 0x4f0   :  { %1019 = vmatpush.msrb.mxu2 %v106_v12 }
 0x4f2   :  { %1020 = vmatpush.msrb.mxu2 %v105_v16 }
 0x4f4   :  { %1021 = vmatpush.msrb.mxu2 %v104_v29 }
 0x53e   :  { %v789_v23 = vpop.xlane.xlu1 %788 }
 0x53f   :  { %v793_v26 = vmul.f32 %v789_v23, %v2556_v20  ;;  %v103_v23 = vld [vmem:[%s3665_s4] sm:$0xff] }
 0x540   :  { %1022 = vmatpush.msrb.mxu2 %v103_v23 }
 0x541   :  { %v795_v27 = vadd.f32 1e-05, %v793_v26  ;;  %v119_v26 = vld [vmem:[%s3665_s4 + $0x80] sm:$0xff] }
 0x542   :  { %1045 = vmatpush.msra.mxu3 %v119_v26 }
 0x543   :  { %2328 = vrsqrt.f32 %v795_v27  ;;  %vm803_vm14 = vweird.f32 %v795_v27 }
 0x546   :  { %v792_v28 = vpop.xlane.xlu2 %791 }
 0x547   :  { %v794_v19 = vmul.f32 %v792_v28, %v2556_v20 }
 0x549   :  { %v2329_v30 = vpop.eup %2328  ;;  %v796_v31 = vadd.f32 1e-05, %v794_v19 }
 0x54a   :  { %v798_v32 = vmul.f32 %v2329_v30, %v795_v27  ;;  %vm804_vm13 = vweird.f32 %v2329_v30 }
 0x54b   :  { %2330 = vrsqrt.f32 %v796_v31  ;;  %vm805_vm15 = vmor %vm803_vm14, %vm804_vm13  ;;  %vm813_vm2 = vweird.f32 %v796_v31 }
 0x54c   :  { %v799_v57 = vmul.f32 %v2329_v30, %v798_v32 }
 0x54e   :  { %v800_v5 = vmul.f32 0.5, %v799_v57 }
 0x550   :  { %v801_v34 = vsub.f32 1.5, %v800_v5 }
 0x551   :  { %v2331_v35 = vpop.eup %2330 }
 0x552   :  { %v802_v36 = vmul.f32 %v2329_v30, %v801_v34  ;;  %v808_v37 = vmul.f32 %v2331_v35, %v796_v31  ;;  %vm814_vm1 = vweird.f32 %v2331_v35 }
 0x553   :  { %vm815_vm3 = vmor %vm813_vm2, %vm814_vm1 }
 0x554   :  { %v806_v38 = vsel %vm805_vm15, %v2329_v30, %v802_v36  ;;  %v809_v40 = vmul.f32 %v2331_v35, %v808_v37 }
 0x555   :  { %v817_v41 = vmul.f32 %v806_v38, %v2843_v47 }
 0x556   :  { %v810_v42 = vmul.f32 0.5, %v809_v40 }
 0x557   :  { %v823_v43 = vmul.f32 %v2287_v33, %v817_v41 }
 0x558   :  { %v811_v45 = vsub.f32 1.5, %v810_v42 }
 0x559   :  { %2106 = vmatmul.msk.f32.vlgmr.msra.gmra.mxu2 %vm137_vm0, %v823_v43  ;;  %2108 = vmatmul.msk.f32.vlgmr.msrb.gmra.mxu3 %vm137_vm0, %v823_v43 }
 0x55a   :  { %v812_v46 = vmul.f32 %v2331_v35, %v811_v45  ;;  %2110 = vmatmul.msk.f32.vlgmr.msra.gmra.mxu0 %vm137_vm0, %v823_v43  ;;  %2112 = vmatmul.msk.f32.vlgmr.msrb.gmra.mxu1 %vm137_vm0, %v823_v43 }
 0x55c   :  { %v816_v44 = vsel %vm815_vm3, %v2331_v35, %v812_v46 }
 0x55d   :  { %v818_v48 = vmul.f32 %v816_v44, %v2849_v39 }
 0x55f   :  { %v824_v49 = vmul.f32 %v2287_v33, %v818_v48 }
 0x561   :  { %2107 = vmatmul.msk.f32.gmra.mxu2 %vm137_vm0, %v824_v49  ;;  %2109 = vmatmul.msk.f32.gmra.mxu3 %vm137_vm0, %v824_v49 }
 0x562   :  { %2111 = vmatmul.msk.f32.gmra.mxu0 %vm137_vm0, %v824_v49  ;;  %2113 = vmatmul.msk.f32.gmra.mxu1 %vm137_vm0, %v824_v49 }
 0x5d7   :  { %v894_v61 = vpop.f32.mrf.mxu0  ;;  %v917_v17 = vpop.f32.mrf.mxu1 }
 0x5dc   :  { %v3043_v25 = vpop.f32.mrf.mxu2  ;;  %v3045_v60 = vpop.f32.mrf.mxu3 }
 0x5dd   :  { %v923_v14 = vsub.f32 0.0, %v3043_v25  ;;  %v924_v15 = vsub.f32 0.0, %v3045_v60 }
 0x5df   :  { %v927_v24 = vmul.f32 1.442695, %v923_v14  ;;  %v929_v21 = vmul.f32 1.442695, %v924_v15  ;;  %v897_v23 = vpop.f32.mrf.mxu0 }
 0x5e1   :  { %2332 = vpow2.f32 %v927_v24 }
 0x5e2   :  { %2334 = vpow2.f32 %v929_v21 }
 0x5e4   :  { %v3067_v27 = vpop.f32.mrf.mxu2  ;;  %v3069_v28 = vpop.f32.mrf.mxu3 }
 0x5e5   :  { %v925_v19 = vsub.f32 0.0, %v3067_v27  ;;  %v926_v30 = vsub.f32 0.0, %v3069_v28 }
 0x5e7   :  { %v2333_v31 = vpop.eup %2332  ;;  %v931_v32 = vmul.f32 1.442695, %v925_v19  ;;  %v933_v34 = vmul.f32 1.442695, %v926_v30 }
 0x5e8   :  { %v2335_v57 = vpop.eup %2334  ;;  %v935_v5 = vadd.f32 1.0, %v2333_v31 }
 0x5e9   :  { %v936_v35 = vadd.f32 1.0, %v2335_v57  ;;  %2336 = vpow2.f32 %v931_v32  ;;  %v920_v32 = vpop.f32.mrf.mxu1 }
 0x5ea   :  { %2338 = vrcp.f32 %v935_v5  ;;  %v948_v46 = vand.u32 2147483647, %v935_v5  ;;  %v950_v44 = vand.u32 2147483648, %v935_v5  ;;  %vm944_vm6 = vweird.f32 %v935_v5 }
 0x5eb   :  { %2340 = vrcp.f32 %v936_v35  ;;  %v965_v6 = vand.u32 2147483648, %v936_v35  ;;  %v963_v52 = vand.u32 2147483647, %v936_v35  ;;  %vm959_vm9 = vweird.f32 %v936_v35 }
 0x5ec   :  { %2342 = vpow2.f32 %v933_v34  ;;  %v951_v55 = vor.u32 1.1754944e-38, %v950_v44  ;;  %vm949_vm10 = vcmp.eq.f32.partialorder %v948_v46, 8.507059e+37  ;;  %v2117_v46 = vld [vmem:[%s3662_s1 + $0x58] sm:$0xff]  ;;  %v2116_v44 = vld [vmem:[%s3662_s1 + $0x50] sm:$0xff] }
 0x5ed   :  { %v966_v54 = vor.u32 1.1754944e-38, %v965_v6  ;;  %vm964_vm12 = vcmp.eq.f32.partialorder %v963_v52, 8.507059e+37 }
 0x5ef   :  { %v2337_v36 = vpop.eup %2336 }
 0x5f0   :  { %v2339_v37 = vpop.eup %2338  ;;  %v937_v33 = vadd.f32 1.0, %v2337_v36 }
 0x5f1   :  { %v2341_v38 = vpop.eup %2340  ;;  %v940_v40 = vmul.f32 %v2339_v37, %v935_v5  ;;  %vm945_vm4 = vweird.f32 %v2339_v37 }
 0x5f2   :  { %v2343_v41 = vpop.eup %2342  ;;  %v955_v42 = vmul.f32 %v2341_v38, %v936_v35  ;;  %2344 = vrcp.f32 %v937_v33  ;;  %vm960_vm5 = vweird.f32 %v2341_v38  ;;  %vm946_vm7 = vmor %vm944_vm6, %vm945_vm4  ;;  %v980_v7 = vand.u32 2147483648, %v937_v33 }
 0x5f3   :  { %v941_v43 = vsub.f32 1.0, %v940_v40  ;;  %v938_v45 = vadd.f32 1.0, %v2343_v41  ;;  %vm961_vm11 = vmor %vm959_vm9, %vm960_vm5  ;;  %v978_v10 = vand.u32 2147483647, %v937_v33  ;;  %vm974_vm14 = vweird.f32 %v937_v33 }
 0x5f4   :  { %v956_v48 = vsub.f32 1.0, %v955_v42  ;;  %v981_v16 = vor.u32 1.1754944e-38, %v980_v7 }
 0x5f5   :  { %v942_v49 = vmul.f32 %v2339_v37, %v941_v43  ;;  %2346 = vrcp.f32 %v938_v45  ;;  %v995_v15 = vand.u32 2147483648, %v938_v45  ;;  %v993_v18 = vand.u32 2147483647, %v938_v45  ;;  %v2120_v43 = vld [vmem:[%s3662_s1 + $0x70] sm:$0xff] }
 0x5f6   :  { %v957_v51 = vmul.f32 %v2341_v38, %v956_v48  ;;  %vm979_vm2 = vcmp.eq.f32.partialorder %v978_v10, 8.507059e+37  ;;  %vm989_vm3 = vweird.f32 %v938_v45  ;;  %v2115_v48 = vld [vmem:[%s3662_s1 + $0x48] sm:$0xff] }
 0x5f7   :  { %v943_v53 = vadd.f32 %v2339_v37, %v942_v49  ;;  %v996_v22 = vor.u32 1.1754944e-38, %v995_v15  ;;  %vm994_vm5 = vcmp.eq.f32.partialorder %v993_v18, 8.507059e+37  ;;  %v2114_v49 = vld [vmem:[%s3662_s1 + $0x40] sm:$0xff] }
 0x5f8   :  { %v2345_v2 = vpop.eup %2344  ;;  %v958_v56 = vadd.f32 %v2341_v38, %v957_v51 }
 0x5f9   :  { %v947_v0 = vsel %vm946_vm7, %v2339_v37, %v943_v53  ;;  %v970_v58 = vmul.f32 %v2345_v2, %v937_v33  ;;  %vm975_vm13 = vweird.f32 %v2345_v2 }
 0x5fa   :  { %v952_v62 = vsel %vm949_vm10, %v951_v55, %v947_v0  ;;  %v962_v63 = vsel %vm961_vm11, %v2341_v38, %v958_v56  ;;  %vm976_vm15 = vmor %vm974_vm14, %vm975_vm13 }
 0x5fb   :  { %v2347_v1 = vpop.eup %2346  ;;  %v999_v11 = vmul.f32 %v952_v62, %v3043_v25  ;;  %v967_v50 = vsel %vm964_vm12, %v966_v54, %v962_v63  ;;  %v971_v3 = vsub.f32 1.0, %v970_v58 }
 0x5fc   :  { %v1000_v4 = vmul.f32 %v967_v50, %v3045_v60  ;;  %v985_v8 = vmul.f32 %v2347_v1, %v938_v45  ;;  %vm990_vm1 = vweird.f32 %v2347_v1  ;;  %v2118_v45 = vld [vmem:[%s3662_s1 + $0x60] sm:$0xff] }
 0x5fd   :  { %v1003_v9 = vmul.f32 %v999_v11, %v894_v61  ;;  %v972_v59 = vmul.f32 %v2345_v2, %v971_v3  ;;  %vm991_vm4 = vmor %vm989_vm3, %vm990_vm1 }
 0x5fe   :  { %v1004_v12 = vmul.f32 %v1000_v4, %v917_v17  ;;  %v986_v13 = vsub.f32 1.0, %v985_v8 }
 0x5ff   :  { %v973_v14 = vadd.f32 %v2345_v2, %v972_v59  ;;  %1023 = vmatmul.f32.vlgmr.msrb.gmra.mxu2 %v1003_v9 }
 0x600   :  { %v987_v25 = vmul.f32 %v2347_v1, %v986_v13  ;;  %1046 = vmatmul.f32.vlgmr.msra.gmra.mxu3 %v1004_v12 }
 0x601   :  { %v977_v60 = vsel %vm976_vm15, %v2345_v2, %v973_v14 }
 0x602   :  { %v982_v24 = vsel %vm979_vm2, %v981_v16, %v977_v60  ;;  %v988_v21 = vadd.f32 %v2347_v1, %v987_v25  ;;  %v2404_v25 = vld [vmem:[%s3669_s8] sm:$0xff] }
 0x603   :  { %v1001_v29 = vmul.f32 %v982_v24, %v3067_v27  ;;  %v2405_v60 = vld [vmem:[%s3668_s7] sm:$0xff] }
 0x604   :  { %v992_v26 = vsel %vm991_vm4, %v2347_v1, %v988_v21  ;;  %v2288_v1 = vld [vmem:[%s3666_s5 + $0x1] ss:$0 sm:$0xff] }
 0x605   :  { %v997_v19 = vsel %vm994_vm5, %v996_v22, %v992_v26  ;;  %v1005_v30 = vmul.f32 %v1001_v29, %v897_v23  ;;  %v2406_v22 = vld [vmem:[%s3670_s9] sm:$0xff] }
 0x606   :  { %v1002_v31 = vmul.f32 %v997_v19, %v3069_v28  ;;  %v2407_v19 = vld [vmem:[%s3669_s8 + $0x8] sm:$0xff] }
 0x607   :  { %1026 = vmatmul.f32.gmra.mxu2 %v1005_v30 }
 0x608   :  { %v1006_v57 = vmul.f32 %v1002_v31, %v920_v32  ;;  %v2408_v31 = vld [vmem:[%s3668_s7 + $0x8] sm:$0xff] }
 0x60a   :  { %1049 = vmatmul.f32.gmra.mxu3 %v1006_v57 }
 0x682   :  { %v1024_v5 = vpop.f32.mrf.mxu2 }
 0x683   :  { %v1047_v34 = vpop.f32.mrf.mxu3 }
 0x684   :  { %v1048_v35 = vadd.f32 %v1047_v34, %v1024_v5  ;;  %v2409_v34 = vld [vmem:[%s3670_s9 + $0x8] sm:$0xff]  ;;  %s2060_s9 = sshll.u32 %s3672_s11, 4  ;;  %s2061_s9 = int_to_ptr.hbm [resolvable:$true] %s2060_s9 }
 0x686   :  { %v3078_v36 = vadd.f32 %v1048_v35, %v2843_v47  ;;  %v2121_v47 = vld [vmem:[%s3662_s1 + $0x78] sm:$0xff] }
 0x687   :  { %1194 = vmatpush.msrb.mxu0 %v2121_v47  ;;  %2246 = vmatpush.msra.mxu2 %v2121_v47 }
 0x688   :  { %v1139_v27 = vmul.f32 %v3078_v36, %v3078_v36 }
 0x689   :  { %1195 = vmatpush.msrb.mxu0 %v2120_v43  ;;  %2247 = vmatpush.msra.mxu2 %v2120_v43 }
 0x68a   :  { %v1141_v37 = vsel %vm137_vm0, %v1139_v27, 0.0  ;;  %v1027_v33 = vpop.f32.mrf.mxu2 }
 0x68b   :  { %1142 = vadd.xlane.f32.xlu0 %v1141_v37 }
 0x68d   :  { %v1050_v38 = vpop.f32.mrf.mxu3 }
 0x68e   :  { %v1051_v40 = vadd.f32 %v1050_v38, %v1027_v33 }
 0x690   :  { %v3084_v28 = vadd.f32 %v1051_v40, %v2849_v39  ;;  %v2119_v39 = vld [vmem:[%s3662_s1 + $0x68] sm:$0xff] }
 0x691   :  { %1196 = vmatpush.msrb.mxu0 %v2119_v39  ;;  %2248 = vmatpush.msra.mxu2 %v2119_v39 }
 0x692   :  { %v1140_v41 = vmul.f32 %v3084_v28, %v3084_v28 }
 0x693   :  { %1197 = vmatpush.msrb.mxu0 %v2118_v45  ;;  %2249 = vmatpush.msra.mxu2 %v2118_v45 }
 0x694   :  { %v1144_v42 = vsel %vm137_vm0, %v1140_v41, 0.0 }
 0x695   :  { %1145 = vadd.xlane.f32.xlu2 %v1144_v42  ;;  %1198 = vmatpush.msrb.mxu0 %v2117_v46 }
 0x696   :  { %2250 = vmatpush.msra.mxu2 %v2117_v46 }
 0x697   :  { %1199 = vmatpush.msrb.mxu0 %v2116_v44 }
 0x698   :  { %2251 = vmatpush.msra.mxu2 %v2116_v44  ;;  %v2410_v44 = vld [vmem:[%s3671_s10] sm:$0xff] }
 0x699   :  { %1200 = vmatpush.msrb.mxu0 %v2115_v48 }
 0x69a   :  { %2252 = vmatpush.msra.mxu2 %v2115_v48 }
 0x69b   :  { %1201 = vmatpush.msrb.mxu0 %v2114_v49 }
 0x69c   :  { %2253 = vmatpush.msra.mxu2 %v2114_v49 }
 0x6fe   :  { %v1143_v6 = vpop.xlane.xlu0 %1142 }
 0x6ff   :  { %v1147_v51 = vmul.f32 %v1143_v6, %v2556_v20 }
 0x701   :  { %v1149_v52 = vadd.f32 1e-05, %v1147_v51  ;;  %v2411_v51 = vld [vmem:[%s3671_s10 + $0x10] sm:$0xff] }
 0x703   :  { %2348 = vrsqrt.f32 %v1149_v52  ;;  %vm1157_vm7 = vweird.f32 %v1149_v52 }
 0x708   :  { %v1146_v53 = vpop.xlane.xlu2 %1145 }
 0x709   :  { %v2349_v2 = vpop.eup %2348  ;;  %v1148_v55 = vmul.f32 %v1146_v53, %v2556_v20 }
 0x70a   :  { %v1152_v56 = vmul.f32 %v2349_v2, %v1149_v52  ;;  %vm1158_vm6 = vweird.f32 %v2349_v2 }
 0x70b   :  { %v1150_v0 = vadd.f32 1e-05, %v1148_v55  ;;  %vm1159_vm9 = vmor %vm1157_vm7, %vm1158_vm6 }
 0x70c   :  { %v1153_v54 = vmul.f32 %v2349_v2, %v1152_v56 }
 0x70d   :  { %2350 = vrsqrt.f32 %v1150_v0  ;;  %vm1167_vm11 = vweird.f32 %v1150_v0 }
 0x70e   :  { %v1154_v58 = vmul.f32 0.5, %v1153_v54 }
 0x710   :  { %v1155_v61 = vsub.f32 1.5, %v1154_v58  ;;  %v2413_v58 = vld [vmem:[%s3671_s10 + $0x30] sm:$0xff] }
 0x712   :  { %v1156_v62 = vmul.f32 %v2349_v2, %v1155_v61 }
 0x713   :  { %v2351_v63 = vpop.eup %2350 }
 0x714   :  { %v1160_v11 = vsel %vm1159_vm9, %v2349_v2, %v1156_v62  ;;  %v1162_v50 = vmul.f32 %v2351_v63, %v1150_v0  ;;  %vm1168_vm10 = vweird.f32 %v2351_v63  ;;  %v2412_v2 = vld [vmem:[%s3671_s10 + $0x8] sm:$0xff] }
 0x715   :  { %v1171_v3 = vmul.f32 %v1160_v11, %v3078_v36  ;;  %vm1169_vm12 = vmor %vm1167_vm11, %vm1168_vm10 }
 0x716   :  { %v1163_v4 = vmul.f32 %v2351_v63, %v1162_v50 }
 0x717   :  { %v1178_v7 = vmul.f32 %v2288_v1, %v1171_v3 }
 0x718   :  { %v1164_v8 = vmul.f32 0.5, %v1163_v4  ;;  %v2415_v4 = vld [vmem:[%s3671_s10 + $0x18] sm:$0xff] }
 0x719   :  { %2195 = vmatmul.msk.f32.vlgmr.msrb.gmra.mxu0 %vm137_vm0, %v1178_v7 }
 0x71a   :  { %v1165_v17 = vsub.f32 1.5, %v1164_v8 }
 0x71c   :  { %v1166_v9 = vmul.f32 %v2351_v63, %v1165_v17  ;;  %v2416_v17 = vld [vmem:[%s3671_s10 + $0x28] sm:$0xff] }
 0x71e   :  { %v1170_v59 = vsel %vm1169_vm12, %v2351_v63, %v1166_v9  ;;  %v2414_v63 = vld [vmem:[%s3671_s10 + $0x20] sm:$0xff] }
 0x71f   :  { %v1172_v10 = vmul.f32 %v1170_v59, %v3084_v28 }
 0x721   :  { %v1179_v12 = vmul.f32 %v2288_v1, %v1172_v10 }
 0x723   :  { %2196 = vmatmul.msk.f32.vlgmr.msra.gmra.mxu2 %vm137_vm0, %v1179_v12 }
 0x796   :  { %v1203_v14 = vpop.f32.mrf.mxu0 }
 0x797   :  { %v1209_v24 = vmul.f32 %v2405_v60, %v1203_v14 }
 0x7a6   :  { %v1206_v13 = vpop.f32.mrf.mxu2 }
 0x7a7   :  { %1221 = vrot.lane.b32.xlu1 %v1206_v13, %s2446_s20  ;;  %1213 = vrot.lane.b32.xlu2 %v1206_v13, %s2445_s19  ;;  %v1210_v32 = vmul.f32 %v2408_v31, %v1206_v13  ;;  %v2417_v13 = vld [vmem:[%s3671_s10 + $0x38] sm:$0xff] }
 0x7af   :  { %1211 = vrot.lane.b32.xlu2 %v1203_v14, %s2445_s19 }
 0x7b7   :  { %1219 = vrot.lane.b32.xlu2 %v1203_v14, %s2446_s20 }
 0x801   :  { %v1214_v15 = vpop.permute.xlu2 %1213 }
 0x802   :  { %v1216_v30 = vmul.f32 %v2407_v19, %v1214_v15 }
 0x804   :  { %v1218_v5 = vadd.f32 %v1216_v30, %v1210_v32 }
 0x809   :  { %v1212_v16 = vpop.permute.xlu2 %1211 }
 0x80a   :  { %v1215_v18 = vmul.f32 %v2404_v25, %v1212_v16 }
 0x80c   :  { %v1217_v29 = vadd.f32 %v1215_v18, %v1209_v24 }
 0x811   :  { %v1220_v21 = vpop.permute.xlu2 %1219 }
 0x812   :  { %v1223_v23 = vmul.f32 %v2406_v22, %v1220_v21 }
 0x814   :  { %v3135_v26 = vadd.f32 %v1223_v23, %v1217_v29 }
 0x816   :  { %1229 = vrot.lane.b32.xlu2 %v3135_v26, %s2447_s26 }
 0x819   :  { %v1222_v57 = vpop.permute.xlu1 %1221 }
 0x81a   :  { %v1224_v35 = vmul.f32 %v2409_v34, %v1222_v57 }
 0x81c   :  { %v3148_v27 = vadd.f32 %v1224_v35, %v1218_v5 }
 0x81e   :  { %1299 = vrot.lane.b32.xlu2 %v3135_v26, %s2449_s15  ;;  %1301 = vrot.lane.b32.xlu1 %v3148_v27, %s2449_s15  ;;  %s2455_s15 = smov 128  }
 0x81f   :  { %1231 = vrot.lane.b32.xlu0 %v3148_v27, %s2447_s26  ;;  %s2454_s26 = smov [#allocation2]  }
 0x826   :  { %1297 = vrot.lane.b32.xlu2 %v3148_v27, %s2450_s16  ;;  %1295 = vrot.lane.b32.xlu1 %v3135_v26, %s2450_s16 }
 0x827   :  { %1264 = vrot.lane.b32.xlu0 %v3135_v26, %s2448_s12 }
 0x82e   :  { %1336 = vrot.lane.b32.xlu2 %v3148_v27, %s2451_s17  ;;  %1266 = vrot.lane.b32.xlu1 %v3148_v27, %s2448_s12  ;;  %s2058_s12 = sshll.u32 %s2454_s26, 4  ;;  %s2059_s12 = int_to_ptr.vmem [resolvable:$true] %s2058_s12 }
 0x82f   :  { %1334 = vrot.lane.b32.xlu0 %v3135_v26, %s2451_s17 }
 0x870   :  { %v1230_v37 = vpop.permute.xlu2 %1229 }
 0x878   :  { %v1300_v40 = vpop.permute.xlu2 %1299 }
 0x880   :  { %v1298_v47 = vpop.permute.xlu2 %1297 }
 0x888   :  { %v1337_v45 = vpop.permute.xlu2 %1336 }
 0x890   :  { %v1302_v33 = vpop.permute.xlu1 %1301 }
 0x891   :  { %v1232_v38 = vpop.permute.xlu0 %1231  ;;  %2209 = vmatpush.xpose.msk.msrb.mxu2 %vm236_vm8, %v1302_v33 }
 0x892   :  { %2197 = vmatpush.xpose.msk.msra.mxu1 %vm236_vm8, %v1232_v38  ;;  %2201 = vmatpush.xpose.msk.msra.mxu0 %vm236_vm8, %v1232_v38 }
 0x895   :  { %2210 = vmatpush.xpose.msk.msrb.mxu2 %vm236_vm8, %v1300_v40 }
 0x896   :  { %2198 = vmatpush.xpose.msk.msra.mxu1 %vm236_vm8, %v1230_v37  ;;  %2202 = vmatpush.xpose.msk.msra.mxu0 %vm236_vm8, %v1230_v37 }
 0x898   :  { %v1296_v41 = vpop.permute.xlu1 %1295 }
 0x899   :  { %2199 = vmatmul.msk.f32.vlgmr.msra.gmra.mxu1 %vm236_vm8, %v3135_v26  ;;  %v1265_v42 = vpop.permute.xlu0 %1264 }
 0x89a   :  { %2205 = vmatpush.xpose.msk.msrb.mxu1 %vm236_vm8, %v1302_v33  ;;  %2203 = vmatmul.msk.f32.vlgmr.msra.gmra.mxu0 %vm236_vm8, %v1265_v42 }
 0x89e   :  { %2206 = vmatpush.xpose.msk.msrb.mxu1 %vm236_vm8, %v1300_v40 }
 0x8a0   :  { %v1267_v43 = vpop.permute.xlu1 %1266 }
 0x8a1   :  { %2200 = vmatmul.msk.f32.gmra.mxu1 %vm236_vm8, %v3148_v27  ;;  %v1335_v39 = vpop.permute.xlu0 %1334 }
 0x8a2   :  { %2204 = vmatmul.msk.f32.gmra.mxu0 %vm236_vm8, %v1267_v43  ;;  %2211 = vmatmul.msk.f32.vlgmr.msrb.gmra.mxu2 %vm236_vm8, %v1335_v39 }
 0x8a9   :  { %2207 = vmatmul.msk.f32.vlgmr.msrb.gmra.mxu1 %vm236_vm8, %v1296_v41 }
 0x8aa   :  { %2212 = vmatmul.msk.f32.gmra.mxu2 %vm236_vm8, %v1337_v45 }
 0x8b1   :  { %2208 = vmatmul.msk.f32.gmra.mxu1 %vm236_vm8, %v1298_v47 }
 0x916   :  { %v1258_v46 = vpop.f32.mrf.mxu1 }
 0x917   :  { %v1365_v48 = vadd.f32 %v2410_v44, %v1258_v46  ;;  %v1289_v6 = vpop.f32.mrf.mxu0 }
 0x918   :  { %v1367_v52 = vadd.f32 %v2411_v51, %v1289_v6 }
 0x919   :  { %v1373_v49 = vsel %vm236_vm8, %v1365_v48, -inf }
 0x91a   :  { %1374 = vmax.xlane.f32.xlu1 %v1373_v49  ;;  %v1379_v0 = vsel %vm236_vm8, %v1367_v52, -inf }
 0x91e   :  { %v1261_v53 = vpop.f32.mrf.mxu1 }
 0x91f   :  { %v1366_v55 = vadd.f32 %v2412_v2, %v1261_v53  ;;  %v1292_v3 = vpop.f32.mrf.mxu0 }
 0x920   :  { %v1368_v7 = vadd.f32 %v2415_v4, %v1292_v3 }
 0x921   :  { %v1376_v56 = vsel %vm236_vm8, %v1366_v55, -inf }
 0x922   :  { %1377 = vmax.xlane.f32.xlu0 %v1376_v56  ;;  %1380 = vmax.xlane.f32.xlu1 %v1379_v0  ;;  %v1382_v10 = vsel %vm236_vm8, %v1368_v7, -inf  ;;  %v2276_v0 = vpack.i.bf16 %v3135_v26, %v3148_v27 }
 0x925   :  { %v1359_v54 = vpop.f32.mrf.mxu2 }
 0x926   :  { %v1371_v61 = vadd.f32 %v2413_v58, %v1359_v54  ;;  %v1328_v62 = vpop.f32.mrf.mxu1 }
 0x927   :  { %v1369_v1 = vadd.f32 %v2414_v63, %v1328_v62 }
 0x928   :  { %v1391_v11 = vsel %vm236_vm8, %v1371_v61, -inf }
 0x929   :  { %v1385_v50 = vsel %vm236_vm8, %v1369_v1, -inf }
 0x92a   :  { %1386 = vmax.xlane.f32.xlu2 %v1385_v50  ;;  %1392 = vmax.xlane.f32.xlu1 %v1391_v11 }
 0x92d   :  { %v1362_v12 = vpop.f32.mrf.mxu2 }
 0x92e   :  { %v1331_v8 = vpop.f32.mrf.mxu1  ;;  %v1372_v14 = vadd.f32 %v2417_v13, %v1362_v12 }
 0x92f   :  { %v1370_v9 = vadd.f32 %v2416_v17, %v1331_v8 }
 0x930   :  { %v1394_v15 = vsel %vm236_vm8, %v1372_v14, -inf }
 0x931   :  { %v1388_v59 = vsel %vm236_vm8, %v1370_v9, -inf }
 0x932   :  { %1389 = vmax.xlane.f32.xlu0 %v1388_v59  ;;  %1383 = vmax.xlane.f32.xlu2 %v1382_v10 }
 0x93a   :  { %1395 = vmax.xlane.f32.xlu0 %v1394_v15 }
 0x98d   :  { %v1375_v16 = vpop.xlane.xlu1 %1374 }
 0x98e   :  { %v1397_v25 = vsub.f32 %v1365_v48, %v1375_v16 }
 0x990   :  { %v1405_v18 = vmul.f32 1.442695, %v1397_v25 }
 0x992   :  { %2352 = vpow2.f32 %v1405_v18 }
 0x995   :  { %v1381_v60 = vpop.xlane.xlu1 %1380  ;;  %v1378_v24 = vpop.xlane.xlu0 %1377 }
 0x996   :  { %v1399_v21 = vsub.f32 %v1367_v52, %v1381_v60  ;;  %v1398_v29 = vsub.f32 %v1366_v55, %v1378_v24 }
 0x998   :  { %v3218_v22 = vpop.eup %2352  ;;  %v1409_v23 = vmul.f32 1.442695, %v1399_v21  ;;  %v1407_v19 = vmul.f32 1.442695, %v1398_v29 }
 0x999   :  { %v1421_v30 = vsel %vm236_vm8, %v3218_v22, 0.0 }
 0x99a   :  { %2354 = vpow2.f32 %v1409_v23  ;;  %1422 = vadd.xlane.f32.xlu2 %v1421_v30 }
 0x99b   :  { %2356 = vpow2.f32 %v1407_v19 }
 0x99d   :  { %v1387_v31 = vpop.xlane.xlu2 %1386  ;;  %v1393_v33 = vpop.xlane.xlu1 %1392 }
 0x99e   :  { %v1401_v32 = vsub.f32 %v1369_v1, %v1387_v31  ;;  %v1403_v43 = vsub.f32 %v1371_v61, %v1393_v33 }
 0x9a0   :  { %v3222_v57 = vpop.eup %2354  ;;  %v1413_v5 = vmul.f32 1.442695, %v1401_v32  ;;  %v1417_v44 = vmul.f32 1.442695, %v1403_v43 }
 0x9a1   :  { %v3224_v34 = vpop.eup %2356  ;;  %v1427_v35 = vsel %vm236_vm8, %v3222_v57, 0.0 }
 0x9a2   :  { %2358 = vpow2.f32 %v1413_v5  ;;  %1428 = vadd.xlane.f32.xlu2 %v1427_v35  ;;  %v1424_v37 = vsel %vm236_vm8, %v3224_v34, 0.0 }
 0x9a3   :  { %1425 = vadd.xlane.f32.xlu1 %v1424_v37 }
 0x9a5   :  { %v1384_v38 = vpop.xlane.xlu2 %1383  ;;  %v1390_v40 = vpop.xlane.xlu0 %1389 }
 0x9a6   :  { %v1400_v41 = vsub.f32 %v1368_v7, %v1384_v38  ;;  %v1402_v42 = vsub.f32 %v1370_v9, %v1390_v40 }
 0x9a8   :  { %v3230_v47 = vpop.eup %2358  ;;  %v1411_v39 = vmul.f32 1.442695, %v1400_v41  ;;  %v1415_v45 = vmul.f32 1.442695, %v1402_v42 }
 0x9a9   :  { %v1433_v46 = vsel %vm236_vm8, %v3230_v47, 0.0 }
 0x9aa   :  { %2360 = vpow2.f32 %v1411_v39  ;;  %1434 = vadd.xlane.f32.xlu0 %v1433_v46 }
 0x9ab   :  { %2362 = vpow2.f32 %v1415_v45 }
 0x9ac   :  { %2364 = vpow2.f32 %v1417_v44 }
 0x9ad   :  { %v1396_v48 = vpop.xlane.xlu0 %1395 }
 0x9ae   :  { %v1404_v6 = vsub.f32 %v1372_v14, %v1396_v48 }
 0x9b0   :  { %v3234_v49 = vpop.eup %2360  ;;  %v1419_v2 = vmul.f32 1.442695, %v1404_v6 }
 0x9b1   :  { %v3236_v51 = vpop.eup %2362  ;;  %v1430_v52 = vsel %vm236_vm8, %v3234_v49, 0.0 }
 0x9b2   :  { %1431 = vadd.xlane.f32.xlu2 %v1430_v52  ;;  %v1436_v53 = vsel %vm236_vm8, %v3236_v51, 0.0  ;;  %v3242_v55 = vpop.eup %2364  ;;  %2366 = vpow2.f32 %v1419_v2 }
 0x9b3   :  { %1437 = vadd.xlane.f32.xlu0 %v1436_v53  ;;  %v1439_v56 = vsel %vm236_vm8, %v3242_v55, 0.0  ;;  %v2122_v53 = vld [vmem:[%s3663_s2 + $0x40] sm:$0xff] }
 0x9b8   :  { %v3249_v54 = vpop.eup %2366 }
 0x9b9   :  { %v1442_v58 = vsel %vm236_vm8, %v3249_v54, 0.0 }
 0x9ba   :  { %1440 = vadd.xlane.f32.xlu2 %v1439_v56 }
 0x9bc   :  { %2277 = vrot.lane.b32.xlu1 %v2276_v0, %s2452_s0 }
 0x9c2   :  { %1443 = vadd.xlane.f32.xlu2 %v1442_v58 }
 0x9c7   :  { %2282 = vrot.lane.b32.xlu0 %v2276_v0, %s2453_s23 }
 0xa0d   :  { %v1423_v61 = vpop.xlane.xlu2 %1422 }
 0xa0e   :  { %2368 = vrcp.f32 %v1423_v61  ;;  %v1456_v13 = vand.u32 2147483648, %v1423_v61  ;;  %vm1450_vm14 = vweird.f32 %v1423_v61  ;;  %v1454_v14 = vand.u32 2147483647, %v1423_v61 }
 0xa10   :  { %v1457_v24 = vor.u32 1.1754944e-38, %v1456_v13  ;;  %vm1455_vm1 = vcmp.eq.f32.partialorder %v1454_v14, 8.507059e+37 }
 0xa14   :  { %v2369_v63 = vpop.eup %2368 }
 0xa15   :  { %v1446_v1 = vmul.f32 %v2369_v63, %v1423_v61  ;;  %v3257_v11 = vpop.xlane.xlu2 %1428  ;;  %vm1451_vm13 = vweird.f32 %v2369_v63 }
 0xa16   :  { %v3254_v62 = vpop.xlane.xlu1 %1425  ;;  %vm1452_vm15 = vmor %vm1450_vm14, %vm1451_vm13  ;;  %vm1480_vm11 = vweird.f32 %v3257_v11 }
 0xa17   :  { %2370 = vrcp.f32 %v3254_v62  ;;  %v1447_v27 = vsub.f32 1.0, %v1446_v1  ;;  %v1471_v37 = vand.u32 2147483648, %v3254_v62  ;;  %vm1465_vm3 = vweird.f32 %v3254_v62 }
 0xa18   :  { %v1469_v40 = vand.u32 2147483647, %v3254_v62  ;;  %v1486_v1 = vand.u32 2147483648, %v3257_v11 }
 0xa19   :  { %v1448_v4 = vmul.f32 %v2369_v63, %v1447_v27  ;;  %v1472_v48 = vor.u32 1.1754944e-38, %v1471_v37 }
 0xa1a   :  { %vm1470_vm9 = vcmp.eq.f32.partialorder %v1469_v40, 8.507059e+37 }
 0xa1b   :  { %v1449_v59 = vadd.f32 %v2369_v63, %v1448_v4  ;;  %v1484_v4 = vand.u32 2147483647, %v3257_v11 }
 0xa1d   :  { %v3259_v26 = vpop.xlane.xlu0 %1434  ;;  %v3262_v50 = vpop.eup %2370  ;;  %v1453_v16 = vsel %vm1452_vm15, %v2369_v63, %v1449_v59 }
 0xa1e   :  { %2372 = vrcp.f32 %v3259_v26  ;;  %v1461_v7 = vmul.f32 %v3262_v50, %v3254_v62  ;;  %v1458_v23 = vsel %vm1455_vm1, %v1457_v24, %v1453_v16  ;;  %vm1466_vm2 = vweird.f32 %v3262_v50 }
 0xa1f   :  { %2374 = vrcp.f32 %v3257_v11  ;;  %v1459_v38 = vmul.f32 %v3218_v22, %v1458_v23  ;;  %vm3300_vm5 = vmor %vm1465_vm3, %vm1466_vm2  ;;  %v1516_v46 = vand.u32 2147483648, %v3259_v26  ;;  %vm1510_vm6 = vweird.f32 %v3259_v26 }
 0xa20   :  { %v1462_v10 = vsub.f32 1.0, %v1461_v7  ;;  %v1514_v6 = vand.u32 2147483647, %v3259_v26  ;;  %vm1485_vm1 = vcmp.eq.f32.partialorder %v1484_v4, 8.507059e+37 }
 0xa21   :  { %v1517_v61 = vor.u32 1.1754944e-38, %v1516_v46 }
 0xa22   :  { %v1463_v18 = vmul.f32 %v3262_v50, %v1462_v10  ;;  %vm1515_vm12 = vcmp.eq.f32.partialorder %v1514_v6, 8.507059e+37  ;;  %v2125_v6 = vld [vmem:[%s3663_s2 + $0x58] sm:$0xff] }
 0xa23   :  { %1632 = vmatpush.msrb.mxu0 %v2125_v6  ;;  %v2131_v6 = vld [vmem:[%s3664_s3 + $0x108] sm:$0xff] }
 0xa24   :  { %v3265_v3 = vpop.eup %2372  ;;  %v1464_v5 = vadd.f32 %v3262_v50, %v1463_v18 }
 0xa25   :  { %v3269_v8 = vpop.xlane.xlu2 %1431  ;;  %v1506_v9 = vmul.f32 %v3265_v3, %v3259_v26  ;;  %v3276_v12 = vpop.eup %2374  ;;  %vm1511_vm4 = vweird.f32 %v3265_v3 }
 0xa26   :  { %v3271_v17 = vpop.xlane.xlu0 %1437  ;;  %v1476_v25 = vmul.f32 %v3276_v12, %v3257_v11  ;;  %v1468_v44 = vsel %vm3300_vm5, %v3262_v50, %v1464_v5  ;;  %vm3318_vm7 = vmor %vm1510_vm6, %vm1511_vm4  ;;  %vm1481_vm10 = vweird.f32 %v3276_v12  ;;  %v1487_v11 = vor.u32 1.1754944e-38, %v1486_v1 }
 0xa27   :  { %2376 = vrcp.f32 %v3271_v17  ;;  %v1507_v15 = vsub.f32 1.0, %v1506_v9  ;;  %v1473_v58 = vsel %vm1470_vm9, %v1472_v48, %v1468_v44  ;;  %vm3335_vm13 = vmor %vm1480_vm11, %vm1481_vm10  ;;  %v1531_v14 = vand.u32 2147483648, %v3271_v17  ;;  %v2127_v48 = vld [vmem:[%s3663_s2 + $0x68] sm:$0xff] }
 0xa28   :  { %2378 = vrcp.f32 %v3269_v8  ;;  %v1477_v32 = vsub.f32 1.0, %v1476_v25  ;;  %vm1525_vm15 = vweird.f32 %v3271_v17  ;;  %v1529_v25 = vand.u32 2147483647, %v3271_v17  ;;  %1708 = vmatpush.msra.mxu2 %v2127_v48  ;;  %v2137_v48 = vld [vmem:[%s3664_s3 + $0x138] sm:$0xff] }
 0xa29   :  { %v1508_v19 = vmul.f32 %v3265_v3, %v1507_v15  ;;  %v1532_v23 = vor.u32 1.1754944e-38, %v1531_v14  ;;  %vm1495_vm5 = vweird.f32 %v3269_v8 }
 0xa2a   :  { %v1478_v45 = vmul.f32 %v3276_v12, %v1477_v32  ;;  %vm1530_vm4 = vcmp.eq.f32.partialorder %v1529_v25, 8.507059e+37 }
 0xa2b   :  { %v1509_v41 = vadd.f32 %v3265_v3, %v1508_v19 }
 0xa2c   :  { %v1479_v63 = vadd.f32 %v3276_v12, %v1478_v45 }
 0xa2d   :  { %v3282_v60 = vpop.eup %2376  ;;  %v3284_v21 = vpop.xlane.xlu2 %1440  ;;  %v1513_v2 = vsel %vm3318_vm7, %v3265_v3, %v1509_v41  ;;  %v1474_v3 = vmul.f32 %v3224_v34, %v1473_v58 }
 0xa2e   :  { %2380 = vrcp.f32 %v3284_v21  ;;  %v2278_v29 = vpop.permute.xlu1 %2277  ;;  %v1521_v30 = vmul.f32 %v3282_v60, %v3271_v17  ;;  %v3292_v35 = vpop.eup %2378  ;;  %v1518_v27 = vsel %vm1515_vm12, %v1517_v61, %v1513_v2  ;;  %vm1526_vm14 = vweird.f32 %v3282_v60  ;;  %v2129_v2 = vld [vmem:[%s3663_s2 + $0x78] sm:$0xff] }
 0xa2f   :  { %v2279_v31 = vunpack.i.l.bf16 %v2278_v29  ;;  %v2280_v33 = vunpack.i.h.bf16 %v2278_v29  ;;  %v1491_v22 = vmul.f32 %v3292_v35, %v3269_v8  ;;  %v1483_v34 = vsel %vm3335_vm13, %v3276_v12, %v1479_v63  ;;  %vm1527_vm2 = vmor %vm1525_vm15, %vm1526_vm14 }
 0xa30   :  { %v1522_v42 = vsub.f32 1.0, %v1521_v30  ;;  %v1519_v16 = vmul.f32 %v3230_v47, %v1518_v27  ;;  %v1488_v29 = vsel %vm1485_vm1, %v1487_v11, %v1483_v34  ;;  %vm1496_vm3 = vweird.f32 %v3292_v35 }
 0xa31   :  { %1597 = vmatpush.msrb.mxu3 %v2279_v31  ;;  %v1492_v62 = vsub.f32 1.0, %v1491_v22  ;;  %v1501_v47 = vand.u32 2147483648, %v3269_v8  ;;  %v1489_v17 = vmul.f32 %v3222_v57, %v1488_v29  ;;  %v1499_v31 = vand.u32 2147483647, %v3269_v8  ;;  %vm1497_vm6 = vmor %vm1495_vm5, %vm1496_vm3 }
 0xa32   :  { %v1523_v56 = vmul.f32 %v3282_v60, %v1522_v42  ;;  %vm1540_vm9 = vweird.f32 %v3284_v21 }
 0xa33   :  { %1598 = vmatpush.msrb.mxu3 %v2280_v33  ;;  %v1493_v13 = vmul.f32 %v3292_v35, %v1492_v62  ;;  %v1502_v33 = vor.u32 1.1754944e-38, %v1501_v47  ;;  %vm1500_vm10 = vcmp.eq.f32.partialorder %v1499_v31, 8.507059e+37  ;;  %v2159_v47 = vld [vmem:[%s3664_s3 + $0x1e8] sm:$0xff] }
 0xa34   :  { %v3304_v39 = vpop.eup %2380  ;;  %2213 = vmatmul.msk.f32.vlgmr.msrb.gmra.mxu3 %vm236_vm8, %v1459_v38  ;;  %v1524_v59 = vadd.f32 %v3282_v60, %v1523_v56  ;;  %v1544_v38 = vand.u32 2147483647, %v3284_v21  ;;  %v2128_v56 = vld [vmem:[%s3663_s2 + $0x70] sm:$0xff]  ;;  %v2155_v31 = vld [vmem:[%s3664_s3 + $0x1c8] sm:$0xff] }
 0xa35   :  { %v3316_v52 = vpop.xlane.xlu2 %1443  ;;  %v1536_v0 = vmul.f32 %v3304_v39, %v3284_v21  ;;  %v1494_v19 = vadd.f32 %v3292_v35, %v1493_v13  ;;  %vm1541_vm7 = vweird.f32 %v3304_v39 }
 0xa36   :  { %2382 = vrcp.f32 %v3316_v52  ;;  %v1528_v12 = vsel %vm1527_vm2, %v3282_v60, %v1524_v59  ;;  %v1546_v60 = vand.u32 2147483648, %v3284_v21  ;;  %vm1542_vm11 = vmor %vm1540_vm9, %vm1541_vm7  ;;  %vm1545_vm12 = vcmp.eq.f32.partialorder %v1544_v38, 8.507059e+37  ;;  %v2146_v38 = vld [vmem:[%s3664_s3 + $0x180] sm:$0xff] }
 0xa37   :  { %v1537_v7 = vsub.f32 1.0, %v1536_v0  ;;  %v1533_v30 = vsel %vm1530_vm4, %v1532_v23, %v1528_v12  ;;  %v1498_v37 = vsel %vm1497_vm6, %v3292_v35, %v1494_v19  ;;  %vm1555_vm14 = vweird.f32 %v3316_v52  ;;  %v2158_v19 = vld [vmem:[%s3664_s3 + $0x1e0] sm:$0xff] }
 0xa38   :  { %v1534_v57 = vmul.f32 %v3236_v51, %v1533_v30  ;;  %v1503_v40 = vsel %vm1500_vm10, %v1502_v33, %v1498_v37  ;;  %v1547_v42 = vor.u32 1.1754944e-38, %v1546_v60  ;;  %v1561_v51 = vand.u32 2147483648, %v3316_v52  ;;  %1836 = vmatpush.msra.mxu3 %v2158_v19  ;;  %v2154_v30 = vld [vmem:[%s3664_s3 + $0x1c0] sm:$0xff]  ;;  %v2151_v37 = vld [vmem:[%s3664_s3 + $0x1a8] sm:$0xff]  ;;  %v2152_v33 = vld [vmem:[%s3664_s3 + $0x1b0] sm:$0xff] }
 0xa39   :  { %v2283_v26 = vpop.permute.xlu0 %2282  ;;  %v1538_v18 = vmul.f32 %v3304_v39, %v1537_v7  ;;  %v1504_v35 = vmul.f32 %v3234_v49, %v1503_v40  ;;  %v1559_v46 = vand.u32 2147483647, %v3316_v52  ;;  %v2150_v60 = vld [vmem:[%s3664_s3 + $0x1a0] sm:$0xff]  ;;  %v2148_v40 = vld [vmem:[%s3664_s3 + $0x190] sm:$0xff] }
 0xa3a   :  { %v2284_v50 = vunpack.i.l.bf16 %v2283_v26  ;;  %v2285_v15 = vunpack.i.h.bf16 %v2283_v26  ;;  %1837 = vmatpush.msra.mxu3 %v2154_v30  ;;  %v2176_v19 = vld [vmem:[%s3665_s4 + $0x170] sm:$0xff]  ;;  %v2174_v30 = vld [vmem:[%s3665_s4 + $0x160] sm:$0xff] }
 0xa3b   :  { %v1539_v5 = vadd.f32 %v3304_v39, %v1538_v18  ;;  %vm1560_vm1 = vcmp.eq.f32.partialorder %v1559_v46, 8.507059e+37  ;;  %v2140_v46 = vld [vmem:[%s3664_s3 + $0x150] sm:$0xff] }
 0xa3c   :  { %v3341_v10 = vpop.eup %2382  ;;  %2214 = vmatmul.msk.f32.gmra.mxu3 %vm236_vm8, %v1474_v3  ;;  %1673 = vmatpush.msra.mxu1 %v2284_v50 }
 0xa3d   :  { %v1551_v24 = vmul.f32 %v3341_v10, %v3316_v52  ;;  %v1543_v41 = vsel %vm1542_vm11, %v3304_v39, %v1539_v5  ;;  %vm1556_vm13 = vweird.f32 %v3341_v10  ;;  %v1562_v39 = vor.u32 1.1754944e-38, %v1561_v51  ;;  %v2123_v52 = vld [vmem:[%s3663_s2 + $0x48] sm:$0xff]  ;;  %v2157_v5 = vld [vmem:[%s3664_s3 + $0x1d8] sm:$0xff]  ;;  %1838 = vmatpush.msra.mxu3 %v2150_v60  ;;  %v2138_v51 = vld [vmem:[%s3664_s3 + $0x140] sm:$0xff] }
 0xa3e   :  { %1674 = vmatpush.msra.mxu1 %v2285_v15  ;;  %v1548_v43 = vsel %vm1545_vm12, %v1547_v42, %v1543_v41  ;;  %vm1557_vm15 = vmor %vm1555_vm14, %vm1556_vm13  ;;  %v2149_v41 = vld [vmem:[%s3664_s3 + $0x198] sm:$0xff]  ;;  %v2142_v42 = vld [vmem:[%s3664_s3 + $0x160] sm:$0xff] }
 0xa3f   :  { %2219 = vmatmul.msk.f32.vlgmr.msra.gmra.mxu1 %vm236_vm8, %v1519_v16  ;;  %v1552_v32 = vsub.f32 1.0, %v1551_v24  ;;  %v1549_v21 = vmul.f32 %v3242_v55, %v1548_v43  ;;  %v2126_v55 = vld [vmem:[%s3663_s2 + $0x60] sm:$0xff]  ;;  %1839 = vmatpush.msra.mxu3 %v2146_v38  ;;  %v2144_v43 = vld [vmem:[%s3664_s3 + $0x170] sm:$0xff] }
 0xa40   :  { %1709 = vmatpush.msra.mxu2 %v2126_v55  ;;  %v2130_v55 = vld [vmem:[%s3664_s3 + $0x100] sm:$0xff]  ;;  %v2172_v60 = vld [vmem:[%s3665_s4 + $0x150] sm:$0xff] }
 0xa41   :  { %v1553_v8 = vmul.f32 %v3341_v10, %v1552_v32  ;;  %v2156_v32 = vld [vmem:[%s3664_s3 + $0x1d0] sm:$0xff]  ;;  %1840 = vmatpush.msra.mxu3 %v2142_v42  ;;  %v2170_v38 = vld [vmem:[%s3665_s4 + $0x140] sm:$0xff] }
 0xa42   :  { %1766 = vmatpush.msrb.mxu2 %v2123_v52  ;;  %v2133_v52 = vld [vmem:[%s3664_s3 + $0x118] sm:$0xff]  ;;  %v2168_v42 = vld [vmem:[%s3665_s4 + $0x130] sm:$0xff] }
 0xa43   :  { %v1554_v45 = vadd.f32 %v3341_v10, %v1553_v8  ;;  %v2147_v8 = vld [vmem:[%s3664_s3 + $0x188] sm:$0xff]  ;;  %1841 = vmatpush.msra.mxu3 %v2138_v51  ;;  %v2180_v51 = vld [vmem:[%s3665_s4 + $0x190] sm:$0xff] }
 0xa44   :  { %2215 = vmatmul.msk.f32.gmra.mxu3 %vm236_vm8, %v1489_v17  ;;  %1767 = vmatpush.msrb.mxu2 %v2122_v53  ;;  %v2160_v17 = vld [vmem:[%s3664_s3 + $0x1f0] sm:$0xff] }
 0xa45   :  { %v1558_v49 = vsel %vm1557_vm15, %v3341_v10, %v1554_v45  ;;  %1882 = vmatpush.msrb.mxu1 %v2160_v17  ;;  %v2145_v45 = vld [vmem:[%s3664_s3 + $0x178] sm:$0xff]  ;;  %v2175_v17 = vld [vmem:[%s3665_s4 + $0x168] sm:$0xff] }
 0xa46   :  { %v1563_v22 = vsel %vm1560_vm1, %v1562_v39, %v1558_v49  ;;  %v2141_v49 = vld [vmem:[%s3664_s3 + $0x158] sm:$0xff]  ;;  %v2134_v39 = vld [vmem:[%s3664_s3 + $0x120] sm:$0xff] }
 0xa47   :  { %2220 = vmatmul.msk.f32.gmra.mxu1 %vm236_vm8, %v1534_v57  ;;  %v1564_v44 = vmul.f32 %v3249_v54, %v1563_v22  ;;  %v2124_v54 = vld [vmem:[%s3663_s2 + $0x50] sm:$0xff]  ;;  %v2153_v57 = vld [vmem:[%s3664_s3 + $0x1b8] sm:$0xff]  ;;  %v2135_v22 = vld [vmem:[%s3664_s3 + $0x128] sm:$0xff]  ;;  %1842 = vmatpush.msra.mxu3 %v2134_v39 }
 0xa48   :  { %1633 = vmatpush.msrb.mxu0 %v2124_v54  ;;  %1883 = vmatpush.msrb.mxu1 %v2156_v32  ;;  %v2132_v54 = vld [vmem:[%s3664_s3 + $0x110] sm:$0xff]  ;;  %v2173_v32 = vld [vmem:[%s3665_s4 + $0x158] sm:$0xff] }
 0xa49   :  { %1843 = vmatpush.msra.mxu3 %v2130_v55  ;;  %v2164_v55 = vld [vmem:[%s3665_s4 + $0x110] sm:$0xff] }
 0xa4a   :  { %1737 = vmatpush.msra.mxu0 %v2129_v2  ;;  %1884 = vmatpush.msrb.mxu1 %v2152_v33  ;;  %v2171_v33 = vld [vmem:[%s3665_s4 + $0x148] sm:$0xff] }
 0xa4c   :  { %2216 = vmatmul.msk.f32.gmra.mxu3 %vm236_vm8, %v1504_v35  ;;  %1738 = vmatpush.msra.mxu0 %v2128_v56  ;;  %v2143_v35 = vld [vmem:[%s3664_s3 + $0x168] sm:$0xff] }
 0xa4d   :  { %1885 = vmatpush.msrb.mxu1 %v2148_v40  ;;  %v2169_v40 = vld [vmem:[%s3665_s4 + $0x138] sm:$0xff] }
 0xa4f   :  { %2221 = vmatmul.msk.f32.gmra.mxu1 %vm236_vm8, %v1549_v21  ;;  %v2139_v21 = vld [vmem:[%s3664_s3 + $0x148] sm:$0xff] }
 0xa50   :  { %1886 = vmatpush.msrb.mxu1 %v2144_v43 }
 0xa52   :  { %1887 = vmatpush.msrb.mxu1 %v2140_v46  ;;  %v2166_v46 = vld [vmem:[%s3665_s4 + $0x120] sm:$0xff] }
 0xa57   :  { %2222 = vmatmul.msk.f32.gmra.mxu1 %vm236_vm8, %v1564_v44  ;;  %v2136_v44 = vld [vmem:[%s3664_s3 + $0x130] sm:$0xff] }
 0xa58   :  { %1888 = vmatpush.msrb.mxu1 %v2136_v44  ;;  %v2178_v44 = vld [vmem:[%s3665_s4 + $0x180] sm:$0xff] }
 0xa5a   :  { %1889 = vmatpush.msrb.mxu1 %v2132_v54 }
 0xab7   :  { %v1600_v0 = vpop.f32.mrf.mxu3 }
 0xabc   :  { %v1676_v58 = vpop.f32.mrf.mxu1 }
 0xabd   :  { %2223 = vmatmul.msk.f32.vlgmr.msra.gmra.mxu2 %vm236_vm8, %v1676_v58 }
 0xabf   :  { %v1603_v61 = vpop.f32.mrf.mxu3 }
 0xac4   :  { %v1679_v62 = vpop.f32.mrf.mxu1 }
 0xac5   :  { %2224 = vmatmul.msk.f32.gmra.mxu2 %vm236_vm8, %v1679_v62 }
 0xac7   :  { %v1606_v63 = vpop.f32.mrf.mxu3 }
 0xac8   :  { %2217 = vmatmul.msk.f32.vlgmr.msrb.gmra.mxu0 %vm236_vm8, %v1606_v63 }
 0xac9   :  { %1859 = vmatpush.msrb.mxu0 %v2159_v47  ;;  %v2189_v47 = vld [vmem:[%s3665_s4 + $0x1d8] sm:$0xff] }
 0xacb   :  { %1860 = vmatpush.msrb.mxu0 %v2155_v31  ;;  %v2187_v31 = vld [vmem:[%s3665_s4 + $0x1c8] sm:$0xff] }
 0xacc   :  { %v1682_v26 = vpop.f32.mrf.mxu1 }
 0xacd   :  { %2227 = vmatmul.msk.f32.vlgmr.msrb.gmra.mxu2 %vm236_vm8, %v1600_v0  ;;  %1861 = vmatpush.msrb.mxu0 %v2151_v37  ;;  %v2185_v37 = vld [vmem:[%s3665_s4 + $0x1b8] sm:$0xff] }
 0xacf   :  { %v1609_v1 = vpop.f32.mrf.mxu3  ;;  %1862 = vmatpush.msrb.mxu0 %v2147_v8  ;;  %v2183_v8 = vld [vmem:[%s3665_s4 + $0x1a8] sm:$0xff] }
 0xad0   :  { %2218 = vmatmul.msk.f32.gmra.mxu0 %vm236_vm8, %v1609_v1 }
 0xad1   :  { %1863 = vmatpush.msrb.mxu0 %v2143_v35  ;;  %v2181_v35 = vld [vmem:[%s3665_s4 + $0x198] sm:$0xff] }
 0xad3   :  { %1864 = vmatpush.msrb.mxu0 %v2139_v21 }
 0xad4   :  { %v1685_v27 = vpop.f32.mrf.mxu1 }
 0xad5   :  { %2228 = vmatmul.msk.f32.gmra.mxu2 %vm236_vm8, %v1603_v61  ;;  %1865 = vmatpush.msrb.mxu0 %v2135_v22  ;;  %v2165_v22 = vld [vmem:[%s3665_s4 + $0x118] sm:$0xff] }
 0xad7   :  { %1866 = vmatpush.msrb.mxu0 %v2131_v6 }
 0xad8   :  { %2225 = vmatmul.msk.f32.vlgmr.msra.gmra.mxu0 %vm236_vm8, %v1682_v26 }
 0xae0   :  { %2226 = vmatmul.msk.f32.gmra.mxu0 %vm236_vm8, %v1685_v27 }
 0xb40   :  { %v1711_v50 = vpop.f32.mrf.mxu2 }
 0xb45   :  { %v1635_v3 = vpop.f32.mrf.mxu0 }
 0xb48   :  { %v1714_v4 = vpop.f32.mrf.mxu2 }
 0xb4d   :  { %v1638_v7 = vpop.f32.mrf.mxu0 }
 0xb50   :  { %v1769_v9 = vpop.f32.mrf.mxu2 }
 0xb51   :  { %v1770_v59 = vadd.f32 %v1769_v9, %v1635_v3 }
 0xb53   :  { %v1775_v10 = vadd.f32 %v1770_v59, %v1711_v50 }
 0xb55   :  { %v1740_v13 = vpop.f32.mrf.mxu0 }
 0xb56   :  { %v1777_v14 = vadd.f32 %v1775_v10, %v1740_v13 }
 0xb58   :  { %v3419_v15 = vadd.f32 %v1777_v14, %v3078_v36  ;;  %v1772_v34 = vpop.f32.mrf.mxu2 }
 0xb59   :  { %v1773_v11 = vadd.f32 %v1772_v34, %v1638_v7  ;;  %v2289_v7 = vld [vmem:[%s3667_s6 + $0x1] ss:$0 sm:$0xff] }
 0xb5a   :  { %v1781_v16 = vmul.f32 %v3419_v15, %v3419_v15 }
 0xb5b   :  { %v1776_v25 = vadd.f32 %v1773_v11, %v1714_v4 }
 0xb5c   :  { %v1783_v18 = vsel %vm137_vm0, %v1781_v16, 0.0 }
 0xb5d   :  { %1784 = vadd.xlane.f32.xlu1 %v1783_v18  ;;  %v1743_v24 = vpop.f32.mrf.mxu0  ;;  %v2193_v18 = vld [vmem:[%s3665_s4 + $0x1f8] sm:$0xff] }
 0xb5e   :  { %v1778_v29 = vadd.f32 %v1776_v25, %v1743_v24  ;;  %2027 = vmatpush.msra.mxu0 %v2193_v18  ;;  %v2192_v24 = vld [vmem:[%s3665_s4 + $0x1f0] sm:$0xff] }
 0xb60   :  { %v3425_v12 = vadd.f32 %v1778_v29, %v3084_v28  ;;  %v2161_v28 = vld [vmem:[%s3664_s3 + $0x1f8] sm:$0xff]  ;;  %2028 = vmatpush.msra.mxu0 %v2192_v24  ;;  %v2191_v29 = vld [vmem:[%s3665_s4 + $0x1e8] sm:$0xff] }
 0xb61   :  { %1905 = vmatpush.msra.mxu2 %v2161_v28  ;;  %v2188_v28 = vld [vmem:[%s3665_s4 + $0x1d0] sm:$0xff] }
 0xb62   :  { %v1782_v23 = vmul.f32 %v3425_v12, %v3425_v12  ;;  %2029 = vmatpush.msra.mxu0 %v2191_v29 }
 0xb63   :  { %1906 = vmatpush.msra.mxu2 %v2157_v5  ;;  %v2186_v5 = vld [vmem:[%s3665_s4 + $0x1c0] sm:$0xff] }
 0xb64   :  { %v1786_v36 = vsel %vm137_vm0, %v1782_v23, 0.0  ;;  %v2177_v23 = vld [vmem:[%s3665_s4 + $0x178] sm:$0xff] }
 0xb65   :  { %1787 = vadd.xlane.f32.xlu2 %v1786_v36  ;;  %1907 = vmatpush.msra.mxu2 %v2153_v57  ;;  %v2190_v36 = vld [vmem:[%s3665_s4 + $0x1e0] sm:$0xff]  ;;  %v2184_v57 = vld [vmem:[%s3665_s4 + $0x1b0] sm:$0xff] }
 0xb66   :  { %2004 = vmatpush.msrb.mxu3 %v2177_v23  ;;  %2030 = vmatpush.msra.mxu0 %v2190_v36 }
 0xb67   :  { %1908 = vmatpush.msra.mxu2 %v2149_v41  ;;  %v2182_v41 = vld [vmem:[%s3665_s4 + $0x1a0] sm:$0xff] }
 0xb68   :  { %2005 = vmatpush.msrb.mxu3 %v2176_v19  ;;  %2031 = vmatpush.msra.mxu0 %v2189_v47 }
 0xb69   :  { %1909 = vmatpush.msra.mxu2 %v2145_v45  ;;  %v2167_v45 = vld [vmem:[%s3665_s4 + $0x128] sm:$0xff] }
 0xb6a   :  { %2006 = vmatpush.msrb.mxu3 %v2175_v17  ;;  %2032 = vmatpush.msra.mxu0 %v2188_v28 }
 0xb6b   :  { %1910 = vmatpush.msra.mxu2 %v2141_v49  ;;  %v2179_v49 = vld [vmem:[%s3665_s4 + $0x188] sm:$0xff] }
 0xb6c   :  { %2007 = vmatpush.msrb.mxu3 %v2174_v30  ;;  %2033 = vmatpush.msra.mxu0 %v2187_v31 }
 0xb6d   :  { %1911 = vmatpush.msra.mxu2 %v2137_v48 }
 0xb6e   :  { %2008 = vmatpush.msrb.mxu3 %v2173_v32  ;;  %2034 = vmatpush.msra.mxu0 %v2186_v5 }
 0xb6f   :  { %1912 = vmatpush.msra.mxu2 %v2133_v52  ;;  %v2163_v52 = vld [vmem:[%s3665_s4 + $0x108] sm:$0xff] }
 0xb70   :  { %2009 = vmatpush.msrb.mxu3 %v2172_v60  ;;  %2035 = vmatpush.msra.mxu0 %v2185_v37 }
 0xb72   :  { %2010 = vmatpush.msrb.mxu3 %v2171_v33  ;;  %2036 = vmatpush.msra.mxu0 %v2184_v57 }
 0xb74   :  { %2011 = vmatpush.msrb.mxu3 %v2170_v38  ;;  %2037 = vmatpush.msra.mxu0 %v2183_v8 }
 0xb76   :  { %2012 = vmatpush.msrb.mxu3 %v2169_v40  ;;  %2038 = vmatpush.msra.mxu0 %v2182_v41 }
 0xb78   :  { %2013 = vmatpush.msrb.mxu3 %v2168_v42  ;;  %2039 = vmatpush.msra.mxu0 %v2181_v35 }
 0xb7a   :  { %2014 = vmatpush.msrb.mxu3 %v2167_v45  ;;  %2040 = vmatpush.msra.mxu0 %v2180_v51 }
 0xb7c   :  { %2015 = vmatpush.msrb.mxu3 %v2166_v46  ;;  %2041 = vmatpush.msra.mxu0 %v2179_v49 }
 0xb7e   :  { %2016 = vmatpush.msrb.mxu3 %v2165_v22  ;;  %2042 = vmatpush.msra.mxu0 %v2178_v44 }
 0xb80   :  { %2017 = vmatpush.msrb.mxu3 %v2164_v55 }
 0xb82   :  { %2018 = vmatpush.msrb.mxu3 %v2163_v52 }
 0xbd0   :  { %v1785_v53 = vpop.xlane.xlu1 %1784 }
 0xbd1   :  { %v1789_v2 = vmul.f32 %v1785_v53, %v2556_v20 }
 0xbd3   :  { %v1791_v56 = vadd.f32 1e-05, %v1789_v2 }
 0xbd5   :  { %2384 = vrsqrt.f32 %v1791_v56  ;;  %vm1799_vm2 = vweird.f32 %v1791_v56 }
 0xbd8   :  { %v1788_v0 = vpop.xlane.xlu2 %1787 }
 0xbd9   :  { %v1790_v58 = vmul.f32 %v1788_v0, %v2556_v20 }
 0xbdb   :  { %v2385_v61 = vpop.eup %2384  ;;  %v1792_v62 = vadd.f32 1e-05, %v1790_v58 }
 0xbdc   :  { %v1794_v63 = vmul.f32 %v2385_v61, %v1791_v56  ;;  %vm1800_vm8 = vweird.f32 %v2385_v61  ;;  %v2162_v56 = vld [vmem:[%s3665_s4 + $0x100] sm:$0xff] }
 0xbdd   :  { %2386 = vrsqrt.f32 %v1792_v62  ;;  %vm1801_vm3 = vmor %vm1799_vm2, %vm1800_vm8  ;;  %vm1809_vm5 = vweird.f32 %v1792_v62  ;;  %2019 = vmatpush.msrb.mxu3 %v2162_v56 }
 0xbde   :  { %v1795_v1 = vmul.f32 %v2385_v61, %v1794_v63 }
 0xbe0   :  { %v1796_v26 = vmul.f32 0.5, %v1795_v1 }
 0xbe2   :  { %v1797_v27 = vsub.f32 1.5, %v1796_v26 }
 0xbe3   :  { %v2387_v50 = vpop.eup %2386 }
 0xbe4   :  { %v1798_v3 = vmul.f32 %v2385_v61, %v1797_v27  ;;  %v1804_v4 = vmul.f32 %v2387_v50, %v1792_v62  ;;  %vm1810_vm4 = vweird.f32 %v2387_v50 }
 0xbe5   :  { %vm1811_vm6 = vmor %vm1809_vm5, %vm1810_vm4 }
 0xbe6   :  { %v1802_v9 = vsel %vm1801_vm3, %v2385_v61, %v1798_v3  ;;  %v1805_v59 = vmul.f32 %v2387_v50, %v1804_v4 }
 0xbe7   :  { %v1813_v20 = vmul.f32 %v1802_v9, %v3419_v15 }
 0xbe8   :  { %v1806_v10 = vmul.f32 0.5, %v1805_v59 }
 0xbe9   :  { %v1820_v13 = vmul.f32 %v2289_v7, %v1813_v20 }
 0xbea   :  { %v1807_v14 = vsub.f32 1.5, %v1806_v10 }
 0xbeb   :  { %2230 = vmatmul.msk.f32.vlgmr.msra.gmra.mxu3 %vm137_vm0, %v1820_v13  ;;  %2232 = vmatmul.msk.f32.vlgmr.msrb.gmra.mxu0 %vm137_vm0, %v1820_v13 }
 0xbec   :  { %v1808_v34 = vmul.f32 %v2387_v50, %v1807_v14  ;;  %2234 = vmatmul.msk.f32.vlgmr.msrb.gmra.mxu1 %vm137_vm0, %v1820_v13  ;;  %2236 = vmatmul.msk.f32.vlgmr.msra.gmra.mxu2 %vm137_vm0, %v1820_v13 }
 0xbee   :  { %v1812_v11 = vsel %vm1811_vm6, %v2387_v50, %v1808_v34 }
 0xbef   :  { %v1814_v16 = vmul.f32 %v1812_v11, %v3425_v12 }
 0xbf1   :  { %v1821_v25 = vmul.f32 %v2289_v7, %v1814_v16 }
 0xbf3   :  { %2231 = vmatmul.msk.f32.gmra.mxu3 %vm137_vm0, %v1821_v25  ;;  %2233 = vmatmul.msk.f32.gmra.mxu0 %vm137_vm0, %v1821_v25 }
 0xbf4   :  { %2235 = vmatmul.msk.f32.gmra.mxu1 %vm137_vm0, %v1821_v25  ;;  %2237 = vmatmul.msk.f32.gmra.mxu2 %vm137_vm0, %v1821_v25 }
 0xc68   :  { %v3610_v43 = vpop.f32.mrf.mxu0 }
 0xc69   :  { %v1921_v21 = vsub.f32 0.0, %v3610_v43  ;;  %v1891_v41 = vpop.f32.mrf.mxu1 }
 0xc6b   :  { %v1926_v39 = vmul.f32 1.442695, %v1921_v21 }
 0xc6d   :  { %2388 = vpow2.f32 %v1926_v39 }
 0xc6e   :  { %v3631_v48 = vpop.f32.mrf.mxu3 }
 0xc6f   :  { %v1920_v6 = vsub.f32 0.0, %v3631_v48  ;;  %v1914_v30 = vpop.f32.mrf.mxu2 }
 0xc70   :  { %v3637_v54 = vpop.f32.mrf.mxu0 }
 0xc71   :  { %v1924_v53 = vmul.f32 1.442695, %v1920_v6  ;;  %v1923_v2 = vsub.f32 0.0, %v3637_v54 }
 0xc73   :  { %v2389_v0 = vpop.eup %2388  ;;  %2390 = vpow2.f32 %v1924_v53  ;;  %v1930_v58 = vmul.f32 1.442695, %v1923_v2 }
 0xc74   :  { %v1933_v61 = vadd.f32 1.0, %v2389_v0 }
 0xc75   :  { %2392 = vpow2.f32 %v1930_v58  ;;  %v1894_v58 = vpop.f32.mrf.mxu1 }
 0xc76   :  { %2394 = vrcp.f32 %v1933_v61  ;;  %v3646_v62 = vpop.f32.mrf.mxu3  ;;  %v1962_v59 = vand.u32 2147483648, %v1933_v61  ;;  %v1960_v13 = vand.u32 2147483647, %v1933_v61  ;;  %vm1956_vm9 = vweird.f32 %v1933_v61 }
 0xc77   :  { %v1922_v63 = vsub.f32 0.0, %v3646_v62  ;;  %v1917_v52 = vpop.f32.mrf.mxu2 }
 0xc78   :  { %v1963_v25 = vor.u32 1.1754944e-38, %v1962_v59  ;;  %vm1961_vm11 = vcmp.eq.f32.partialorder %v1960_v13, 8.507059e+37 }
 0xc79   :  { %v2391_v1 = vpop.eup %2390  ;;  %v1928_v26 = vmul.f32 1.442695, %v1922_v63 }
 0xc7a   :  { %v1932_v27 = vadd.f32 1.0, %v2391_v1 }
 0xc7b   :  { %v2393_v50 = vpop.eup %2392  ;;  %2396 = vpow2.f32 %v1928_v26 }
 0xc7c   :  { %v2395_v3 = vpop.eup %2394  ;;  %2398 = vrcp.f32 %v1932_v27  ;;  %v1935_v7 = vadd.f32 1.0, %v2393_v50  ;;  %v1947_v36 = vand.u32 2147483648, %v1932_v27  ;;  %v1945_v28 = vand.u32 2147483647, %v1932_v27 }
 0xc7d   :  { %v1952_v4 = vmul.f32 %v2395_v3, %v1933_v61  ;;  %vm1957_vm7 = vweird.f32 %v2395_v3  ;;  %vm1941_vm13 = vweird.f32 %v1932_v27 }
 0xc7e   :  { %2400 = vrcp.f32 %v1935_v7  ;;  %vm1958_vm10 = vmor %vm1956_vm9, %vm1957_vm7  ;;  %v1992_v60 = vand.u32 2147483648, %v1935_v7  ;;  %v1948_v33 = vor.u32 1.1754944e-38, %v1947_v36  ;;  %v1990_v38 = vand.u32 2147483647, %v1935_v7 }
 0xc7f   :  { %v1953_v9 = vsub.f32 1.0, %v1952_v4  ;;  %vm1946_vm1 = vcmp.eq.f32.partialorder %v1945_v28, 8.507059e+37  ;;  %vm1986_vm8 = vweird.f32 %v1935_v7 }
 0xc80   :  { %v1993_v45 = vor.u32 1.1754944e-38, %v1992_v60  ;;  %vm1991_vm3 = vcmp.eq.f32.partialorder %v1990_v38, 8.507059e+37 }
 0xc81   :  { %v2397_v20 = vpop.eup %2396  ;;  %v1954_v10 = vmul.f32 %v2395_v3, %v1953_v9 }
 0xc82   :  { %v2399_v14 = vpop.eup %2398  ;;  %v1934_v34 = vadd.f32 1.0, %v2397_v20 }
 0xc83   :  { %v1955_v11 = vadd.f32 %v2395_v3, %v1954_v10  ;;  %v1937_v16 = vmul.f32 %v2399_v14, %v1932_v27  ;;  %vm1942_vm12 = vweird.f32 %v2399_v14 }
 0xc84   :  { %2402 = vrcp.f32 %v1934_v34  ;;  %v2401_v18 = vpop.eup %2400  ;;  %vm1943_vm14 = vmor %vm1941_vm13, %vm1942_vm12  ;;  %v1975_v46 = vand.u32 2147483647, %v1934_v34  ;;  %v1977_v49 = vand.u32 2147483648, %v1934_v34  ;;  %vm1971_vm5 = vweird.f32 %v1934_v34 }
 0xc85   :  { %v1959_v24 = vsel %vm1958_vm10, %v2395_v3, %v1955_v11  ;;  %v1938_v29 = vsub.f32 1.0, %v1937_v16  ;;  %v1982_v19 = vmul.f32 %v2401_v18, %v1935_v7  ;;  %vm1987_vm15 = vweird.f32 %v2401_v18 }
 0xc86   :  { %v1964_v23 = vsel %vm1961_vm11, %v1963_v25, %v1959_v24  ;;  %vm1988_vm2 = vmor %vm1986_vm8, %vm1987_vm15  ;;  %v1978_v53 = vor.u32 1.1754944e-38, %v1977_v49  ;;  %vm1976_vm7 = vcmp.eq.f32.partialorder %v1975_v46, 8.507059e+37 }
 0xc87   :  { %v1997_v47 = vmul.f32 %v1964_v23, %v3610_v43  ;;  %v1939_v17 = vmul.f32 %v2399_v14, %v1938_v29  ;;  %v1983_v31 = vsub.f32 1.0, %v1982_v19 }
 0xc89   :  { %v1940_v32 = vadd.f32 %v2399_v14, %v1939_v17  ;;  %v2001_v5 = vmul.f32 %v1997_v47, %v1914_v30  ;;  %v1984_v57 = vmul.f32 %v2401_v18, %v1983_v31 }
 0xc8a   :  { %v2403_v37 = vpop.eup %2402 }
 0xc8b   :  { %v1944_v8 = vsel %vm1943_vm14, %v2399_v14, %v1940_v32  ;;  %v1967_v40 = vmul.f32 %v2403_v37, %v1934_v34  ;;  %2043 = vmatmul.f32.vlgmr.msra.gmra.mxu0 %v2001_v5  ;;  %v1985_v35 = vadd.f32 %v2401_v18, %v1984_v57  ;;  %vm1972_vm4 = vweird.f32 %v2403_v37 }
 0xc8c   :  { %v1949_v42 = vsel %vm1946_vm1, %v1948_v33, %v1944_v8  ;;  %vm1973_vm6 = vmor %vm1971_vm5, %vm1972_vm4 }
 0xc8d   :  { %v1996_v43 = vmul.f32 %v1949_v42, %v3631_v48  ;;  %v1968_v51 = vsub.f32 1.0, %v1967_v40  ;;  %v1989_v21 = vsel %vm1988_vm2, %v2401_v18, %v1985_v35 }
 0xc8e   :  { %v1994_v22 = vsel %vm1991_vm3, %v1993_v45, %v1989_v21 }
 0xc8f   :  { %v2000_v39 = vmul.f32 %v1996_v43, %v1891_v41  ;;  %v1969_v44 = vmul.f32 %v2403_v37, %v1968_v51  ;;  %v1999_v55 = vmul.f32 %v1994_v22, %v3637_v54 }
 0xc91   :  { %v1970_v6 = vadd.f32 %v2403_v37, %v1969_v44  ;;  %2020 = vmatmul.f32.vlgmr.msrb.gmra.mxu3 %v2000_v39  ;;  %v2003_v48 = vmul.f32 %v1999_v55, %v1917_v52 }
 0xc93   :  { %v1974_v2 = vsel %vm1973_vm6, %v2403_v37, %v1970_v6  ;;  %2046 = vmatmul.f32.gmra.mxu0 %v2003_v48 }
 0xc94   :  { %v1979_v56 = vsel %vm1976_vm7, %v1978_v53, %v1974_v2 }
 0xc95   :  { %v1998_v0 = vmul.f32 %v1979_v56, %v3646_v62 }
 0xc97   :  { %v2002_v61 = vmul.f32 %v1998_v0, %v1894_v58 }
 0xc99   :  { %2023 = vmatmul.f32.gmra.mxu3 %v2002_v61 }
 0xd08   :  { %v2044_v63 = vpop.f32.mrf.mxu0 }
 0xd10   :  { %v2047_v27 = vpop.f32.mrf.mxu0 }
 0xd14   :  { %v2021_v1 = vpop.f32.mrf.mxu3 }
 0xd15   :  { %v2045_v26 = vadd.f32 %v2044_v63, %v2021_v1 }
 0xd17   :  { %v2050_v54 = vadd.f32 %v2045_v26, %v3419_v15 }
 0xd19   :  { %2052 = vst.msk [vmem:[#allocation2] sm:$0xff] %vm137_vm0, %v2050_v54 }
 0xd1c   :  { %v2024_v50 = vpop.f32.mrf.mxu3 }
 0xd1d   :  { %v2048_v3 = vadd.f32 %v2047_v27, %v2024_v50 }
 0xd1f   :  { %v2051_v62 = vadd.f32 %v2048_v3, %v3425_v12 }
 0xd21   :  { %2053 = vst.msk [vmem:[#allocation2 + $0x8] sm:$0xff] %vm137_vm0, %v2051_v62 }
 0xd22   :  { %2066 = dma.vmem_to_hbm [thread:$0]  %s2059_s12, 256, %s2061_s9, [#allocation3], %s2455_s15, %s2455_s15, %s2446_s20  }
 0xd23   :  { %2442 = dma.done.wait [#allocation3], 256  }
 0xd24   :  { %2443 = vsyncadd [#allocation3], 4294967040 }
 0xd25   :  { %2071 = vsyncpa [#allocation3], 1 }

</bundles_post_ra>
